<compile_context>
chip_gen: v6e
topology: v6e:2x2x1
jax: 0.10.0
libtpu: 0.0.40
codegen_flags: <defaults>
</compile_context>

<pallas_src>
import numpy as np
import jax
import jax.numpy as jnp
from jax import lax
from jax.experimental import pallas as pl
from jax.experimental.pallas import tpu as pltpu

_F32 = jnp.float32
# Below this footprint a grid-less call is cheapest (per-grid-step overhead ~0.35 us would
# dominate this microsecond-scale kernel); above it, tile per image to bound VMEM.
_SINGLE_SHOT_VMEM_BUDGET = 24 << 20


def _round_up(x, m):
    return ((x + m - 1) // m) * m


def _frn_single_shot(q, w_all, scale_smem, red_np, B, R, C, D, N, n_pad):
    """Grid-less path: one kernel invocation covers every image."""
    if n_pad != N:
        q = jnp.pad(q, ((0, n_pad - N), (0, 0)))
    # Per-image mean matrix (B, n_pad), pre-scaled by 1/R; padded rows get weight 0.
    avg_np = np.zeros((B, n_pad), dtype=np.float32)
    avg_np[:, :N] = np.repeat(np.eye(B, dtype=np.float32), R, axis=1) / R
    red = jnp.asarray(red_np)
    avg = jnp.asarray(avg_np)

    def kernel(scale_ref, q_ref, w_ref, avg_ref, red_ref, out_ref):
        # One lane-dense MXU matmul covering all categories: y = Qbar_c - feat.
        y = jnp.dot(q_ref[...], w_ref[...], preferred_element_type=_F32)    # (n_pad, C*D)
        y2 = y * y
        if B <= C:
            # Contract the cheap (B) side first: reduction FLOPs scale with min(B, C) and
            # the final matmul contracts over the lane-dense C*D axis.
            m = jnp.dot(avg_ref[...], y2, preferred_element_type=_F32)      # (B, C*D)
            dist = jnp.dot(m, red_ref[...], preferred_element_type=_F32)    # (B, C)
        else:
            d_nc = jnp.dot(y2, red_ref[...], preferred_element_type=_F32)   # (n_pad, C)
            dist = jnp.dot(avg_ref[...], d_nc, preferred_element_type=_F32)  # (B, C)
        logits = -dist * scale_ref[0]
        mx = jnp.max(logits, axis=1, keepdims=True)
        sh = logits - mx
        lse = jnp.log(jnp.sum(jnp.exp(sh), axis=1, keepdims=True))
        out_ref[...] = sh - lse

    return pl.pallas_call(
        kernel,
        out_shape=jax.ShapeDtypeStruct((B, C), _F32),
        in_specs=[
            pl.BlockSpec(memory_space=pltpu.MemorySpace.SMEM),   # scale (1,)
            pl.BlockSpec(memory_space=pltpu.MemorySpace.VMEM),   # q     (n_pad, D)
            pl.BlockSpec(memory_space=pltpu.MemorySpace.VMEM),   # w_all (D, C*D)
            pl.BlockSpec(memory_space=pltpu.MemorySpace.VMEM),   # avg   (B, n_pad)
            pl.BlockSpec(memory_space=pltpu.MemorySpace.VMEM),   # red   (C*D, C)
        ],
        out_specs=pl.BlockSpec(memory_space=pltpu.MemorySpace.VMEM),
    )(scale_smem, q, w_all, avg, red)


def _frn_per_image_grid(q, w_all, scale_smem, red_np, B, R, C, D):
    """Per-image grid path: bounds VMEM per step (v7x) and pipelines / parallelizes over images."""
    r_pad = _round_up(R, 8)
    q = q.reshape(B, R, D)
    if r_pad != R:
        q = jnp.pad(q, ((0, 0), (0, r_pad - R), (0, 0)))
    q = q.reshape(B * r_pad, D)
    avg_np = np.zeros((1, r_pad), dtype=np.float32)
    avg_np[0, :R] = 1.0 / R
    red = jnp.asarray(red_np)
    avg = jnp.asarray(avg_np)

    def kernel(scale_ref, q_ref, w_ref, avg_ref, red_ref, out_ref):
        y = jnp.dot(q_ref[...], w_ref[...], preferred_element_type=_F32)    # (r_pad, C*D)
        y2 = y * y
        m = jnp.dot(avg_ref[...], y2, preferred_element_type=_F32)          # (1, C*D)
        dist = jnp.dot(m, red_ref[...], preferred_element_type=_F32)        # (1, C)
        logits = -dist * scale_ref[0]
        mx = jnp.max(logits, axis=1, keepdims=True)
        sh = logits - mx
        lse = jnp.log(jnp.sum(jnp.exp(sh), axis=1, keepdims=True))
        out_ref[...] = (sh - lse).reshape(1, 1, C)

    out = pl.pallas_call(
        kernel,
        out_shape=jax.ShapeDtypeStruct((B, 1, C), _F32),
        grid=(B,),
        in_specs=[
            pl.BlockSpec(memory_space=pltpu.MemorySpace.SMEM),        # scale (1,)
            pl.BlockSpec((r_pad, D), lambda b: (b, 0)),               # image b's rows
            pl.BlockSpec((D, C * D), lambda b: (0, 0)),               # w_all (resident)
            pl.BlockSpec((1, r_pad), lambda b: (0, 0)),               # avg   (resident)
            pl.BlockSpec((C * D, C), lambda b: (0, 0)),               # red   (resident)
        ],
        out_specs=pl.BlockSpec((1, 1, C), lambda b: (b, 0, 0)),
        compiler_params=pltpu.CompilerParams(dimension_semantics=("parallel",)),
    )(scale_smem, q, w_all, avg, red)
    return out.reshape(B, C)


def _frn_forward(feat, cat_mat, scale, r, *, batch_size):
    """Pallas implementation of FRNLayer.forward(feat, batch_size)."""
    N, D = feat.shape
    C, R, D2 = cat_mat.shape
    assert D == D2 and N == batch_size * R
    B = int(batch_size)

    alpha, beta = r[0], r[1]
    lam = (R / D) * jnp.exp(alpha) + 1e-6
    rho = jnp.exp(beta)

    sup = cat_mat.astype(_F32)
    # Per-category Gram sts[c] = S_c^T S_c.  Tiny batched contraction: cheaper as one XLA
    # batched matmul than a grid=(C,) pallas_call.  HIGHEST precision: the SPD solve
    # amplifies Gram rounding when lam is small.
    sts = jnp.einsum("crd,cre->cde", sup, sup, precision=lax.Precision.HIGHEST)  # (C, D, D)
    eye = jnp.eye(D, dtype=_F32)
    # TODO(synk): no Pallas/Mosaic batched linear-solve primitive; the SPD solve stays in
    # XLA (fused into the jitted prologue).  rho is folded into the solve RHS so rho*hat
    # needs no extra (C, D, D) elementwise pass.
    hat_rho = jnp.linalg.solve(sts + lam * eye[None], rho * sts)                  # (C, D, D)
    # feat @ (rho*hat_c - I) == Qbar_c - feat, for all c, as one lane-dense weight slab.
    w_all = jnp.transpose(hat_rho - eye[None], (1, 0, 2)).reshape(D, C * D)       # (D, C*D)

    q = feat.astype(_F32)
    scale_smem = scale.astype(_F32).reshape(1)
    # Per-category D-block-sum indicator (C*D, C): hoisted out of the kernel (static shapes).
    red_np = np.repeat(np.eye(C, dtype=np.float32), D, axis=0)

    # Choose single-shot vs per-image grid from the f32 VMEM footprint of the big intermediates.
    n_pad = _round_up(N, 8)
    single_bytes = 4 * (2 * n_pad * C * D                      # y and y*y
                        + n_pad * D + D * C * D + C * D * C + B * n_pad)
    if single_bytes <= _SINGLE_SHOT_VMEM_BUDGET:
        return _frn_single_shot(q, w_all, scale_smem, red_np, B, R, C, D, N, n_pad)
    return _frn_per_image_grid(q, w_all, scale_smem, red_np, B, R, C, D)


# jit the whole wrapper so the XLA prologue (eye, einsum, solve, reshape, pad) fuses into
# one dispatch around the Pallas call.
frn_forward = jax.jit(_frn_forward, static_argnames=("batch_size",))


def frn_reference(feat, cat_mat, scale, r, batch_size):
    """Pure-JAX reference mirroring the PyTorch module line by line."""
    C, R, D = cat_mat.shape
    alpha, beta = r[0], r[1]
    lam = (R / D) * jnp.exp(alpha) + 1e-6
    rho = jnp.exp(beta)
    hi = lax.Precision.HIGHEST
    st = jnp.transpose(cat_mat, (0, 2, 1))
    sts = jnp.matmul(st, cat_mat, precision=hi)                    # (C, D, D)
    m_inv = jnp.linalg.inv(sts + lam * jnp.eye(D, dtype=feat.dtype)[None])
    hat = jnp.matmul(m_inv, sts, precision=hi)                     # (C, D, D)
    q_bar = jnp.matmul(feat[None], hat, precision=hi) * rho        # (C, N, D)
    dist = jnp.sum((q_bar - feat[None]) ** 2, axis=2).T            # (N, C)
    neg_l2 = -dist.reshape(batch_size, R, C).mean(axis=1)          # (B, C)
    logits = neg_l2 * scale
    return jax.nn.log_softmax(logits, axis=1)


if __name__ == "__main__":
    # Small shapes consistent with the module (resolution fixed at 25 by __init__).
    num_cat = 8
    d = 32
    resolution = 25
    batch_size = 2

    key = jax.random.PRNGKey(0)
    k_feat, k_cat = jax.random.split(key)

    # Deterministic parameter init mirroring FRNLayer.__init__
    scale = jnp.array([1.0], dtype=jnp.float32)            # nn.Parameter([1.0])
    r = jnp.zeros((2,), dtype=jnp.float32)                 # nn.Parameter(zeros(2))
    cat_mat = jax.random.normal(k_cat, (num_cat, resolution, d), dtype=jnp.float32)

    # Input: feat is (batch_size * resolution, d)
    feat = jax.random.normal(k_feat, (batch_size * resolution, d), dtype=jnp.float32)

    out = frn_forward(feat, cat_mat, scale, r, batch_size=batch_size)
    out = jax.block_until_ready(out)

    assert out.shape == (batch_size, num_cat)
    assert bool(jnp.all(jnp.isfinite(out)))
    # log_softmax rows must exponentiate-and-sum to 1
    assert bool(jnp.allclose(jnp.sum(jnp.exp(out), axis=1), 1.0, atol=1e-3))

    ref = frn_reference(feat, cat_mat, scale, r, batch_size)
    assert bool(jnp.allclose(out, ref, atol=5e-3, rtol=5e-3)), float(
        jnp.max(jnp.abs(out - ref)))
    print("KERNEL_OK")
</pallas_src>

<mosaic_0001>
module attributes {stable_mosaic.version = 11 : i64} {
  func.func @kernel(%arg0: memref<1xf32, #tpu.memory_space<smem>>, %arg1: memref<56x32xf32, #tpu.memory_space<vmem>>, %arg2: memref<32x256xf32, #tpu.memory_space<vmem>>, %arg3: memref<2x56xf32, #tpu.memory_space<vmem>>, %arg4: memref<256x8xf32, #tpu.memory_space<vmem>>, %arg5: memref<2x8xf32, #tpu.memory_space<vmem>>) attributes {dimension_semantics = [], scalar_prefetch = 0 : i64, scratch_operands = 0 : i64, tpu.core_type = #tpu.core_type<tc>} {
    %c0 = arith.constant 0 : index
    %c0_0 = arith.constant 0 : index
    %0 = vector.load %arg1[%c0, %c0_0] : memref<56x32xf32, #tpu.memory_space<vmem>>, vector<56x32xf32>
    %c0_1 = arith.constant 0 : index
    %c0_2 = arith.constant 0 : index
    %1 = vector.load %arg2[%c0_1, %c0_2] : memref<32x256xf32, #tpu.memory_space<vmem>>, vector<32x256xf32>
    %cst = arith.constant dense<0.000000e+00> : vector<56x256xf32>
    %2 = tpu.matmul %0, %1, %cst {dimension_numbers = #tpu.dot_dimension_numbers<[1], [0], [0], [1], [0, 0, 1, 1], [], []>} : vector<56x32xf32>, vector<32x256xf32>, vector<56x256xf32> -> vector<56x256xf32>
    %3 = arith.mulf %2, %2 : vector<56x256xf32>
    %c0_3 = arith.constant 0 : index
    %c0_4 = arith.constant 0 : index
    %4 = vector.load %arg3[%c0_3, %c0_4] : memref<2x56xf32, #tpu.memory_space<vmem>>, vector<2x56xf32>
    %cst_5 = arith.constant dense<0.000000e+00> : vector<2x256xf32>
    %5 = tpu.matmul %4, %3, %cst_5 {dimension_numbers = #tpu.dot_dimension_numbers<[1], [0], [0], [1], [0, 0, 1, 1], [], []>} : vector<2x56xf32>, vector<56x256xf32>, vector<2x256xf32> -> vector<2x256xf32>
    %c0_6 = arith.constant 0 : index
    %c0_7 = arith.constant 0 : index
    %6 = vector.load %arg4[%c0_6, %c0_7] : memref<256x8xf32, #tpu.memory_space<vmem>>, vector<256x8xf32>
    %cst_8 = arith.constant dense<0.000000e+00> : vector<2x8xf32>
    %7 = tpu.matmul %5, %6, %cst_8 {dimension_numbers = #tpu.dot_dimension_numbers<[1], [0], [0], [1], [0, 0, 1, 1], [], []>} : vector<2x256xf32>, vector<256x8xf32>, vector<2x8xf32> -> vector<2x8xf32>
    %cst_9 = arith.constant 0.000000e+00 : f32
    %8 = vector.broadcast %cst_9 : f32 to vector<2x8xf32>
    %9 = arith.subf %8, %7 : vector<2x8xf32>
    %c0_10 = arith.constant 0 : index
    %10 = memref.load %arg0[%c0_10] : memref<1xf32, #tpu.memory_space<smem>>
    %11 = vector.broadcast %10 : f32 to vector<2x8xf32>
    %12 = arith.mulf %9, %11 : vector<2x8xf32>
    %cst_11 = arith.constant dense<0xFF800000> : vector<2xf32>
    %13 = vector.multi_reduction <maximumf>, %12, %cst_11 [1] : vector<2x8xf32> to vector<2xf32>
    %14 = vector.shape_cast %13 : vector<2xf32> to vector<2x1xf32>
    %15 = vector.broadcast %14 : vector<2x1xf32> to vector<2x8xf32>
    %16 = arith.subf %12, %15 : vector<2x8xf32>
    %17 = math.exp %16 : vector<2x8xf32>
    %cst_12 = arith.constant dense<0.000000e+00> : vector<2xf32>
    %18 = vector.multi_reduction <add>, %17, %cst_12 [1] : vector<2x8xf32> to vector<2xf32>
    %19 = vector.shape_cast %18 : vector<2xf32> to vector<2x1xf32>
    %20 = math.log %19 : vector<2x1xf32>
    %21 = vector.broadcast %20 : vector<2x1xf32> to vector<2x8xf32>
    %22 = arith.subf %16, %21 : vector<2x8xf32>
    %c0_13 = arith.constant 0 : index
    %c0_14 = arith.constant 0 : index
    %23 = vector.load %arg5[%c0_13, %c0_14] : memref<2x8xf32, #tpu.memory_space<vmem>>, vector<2x8xf32>
    tpu.vector_store %arg5[%c0_13, %c0_14], %22 {strides = array<i32>} : memref<2x8xf32, #tpu.memory_space<vmem>>, vector<2x8xf32>,
    return
  }
}

</mosaic_0001>

<bundles_post_ra>
// kernel: custom-call.8
= control target key start
LH: loop header
LB: loop body
LE: loop exit
PB: predicated region body
PF: predicated region fallthrough
CT: control target
= control target key end

     0   :  { %5 = vsyncpa [#allocation3], 0  ;;  %s1071_s0 = inlined_call_operand.vmem [shape: f32[8,32,32], index: 0, kind: input, shape index: {}]   ;;  %s1072_s1 = inlined_call_operand.vmem [shape: f32[8,32,32], index: 1, kind: output, shape index: {0}]   ;;  %s1073_s2 = inlined_call_operand.hbm [shape: s32[8,32], index: 2, kind: output, shape index: {1}]   ;;  %s1074_s3 = inlined_call_operand.vmem [shape: s32[8,32], index: 3, kind: output, shape index: {2}]  }
   0x1   :  { %7 = vsyncpa [#allocation3 + $0x1], 0  ;;  %s829_s12 = smov 0   ;;  %s831_s13 = smov 0  }
   0x2   :  { %s833_s14 = smov 0   ;;  %s835_s15 = smov 0  }
   0x3 LB: > { %s850_s16 = sadd.s32 4294967295, %s797_s15   ;;  %s627_s17 = sadd.s32 4294967294, %s797_s15   ;;  %s797_s15 = sphi %s835_s15, %s1082_s15   ;;  %s793_s14 = sphi %s833_s14, %s1081_s14   ;;  %s789_s13 = sphi %s831_s13, %s1080_s13   ;;  %s785_s12 = sphi %s829_s12, %s1079_s12  }
   0x4   : > { %s854_s18 = sadd.s32 1, %s797_s15   ;;  %s17_s19 = sshrl.u32 %s797_s15, 3 }
   0x5   : > { %s18_s20 = sshrl.u32 %s854_s18, 3  ;;  %s22_s21 = sadd.s32 1, %s793_s14 }
   0x6   : > { %s19_s22 = ssub.s32 %s17_s19, %s18_s20  ;;  %p32_p0 = scmp.ne.s32.totalorder %s793_s14, %s789_s13 }
   0x7   : > { %p20_p1 = scmp.eq.s32.totalorder %s19_s22, 0  ;;  %p33_p2 = scmp.eq.s32.totalorder %s850_s16, 7 }
   0x8   : > { %p38_p3 = scmp.ne.s32.totalorder %s789_s13, %s785_s12  ;;  %p39_p4 = scmp.eq.s32.totalorder %s627_s17, 7 }
   0x9   : > { %s865_s23 = scalar_select %p20_p1, %s793_s14, %s22_s21  }
   0xa   : > { %p867_p5 = por %p33_p2, %p32_p0  ;;  %p871_p6 = por %p39_p4, %p38_p3 }
   0xb   : > { %p629_p7 = scmp.ge.s32.totalorder %s797_s15, 8 }
   0xc   : > { %s85_s26 = sand.u32 (!%p629_p7), 1, %s797_s15   ;;  %s631_s27 = sshll.u32 (!%p629_p7), %s797_s15, 5 }
   0xd   : > { %83 = sbr.rel (%p629_p7) target bundleno = 21 (0x15), region = 16  ;;  %s630_s28 = sshll.u32 (!%p629_p7), %s85_s26, 5 }
   0xe   : > { %s89_s4 = scalar_lea.vmem (!%p629_p7), %s1071_s0, %s631_s27  ;;  %s87_s5 = scalar_lea.vmem (!%p629_p7), [#allocation0], %s630_s28 }
  0x12   : > { %v102_v0 = vld [vmem:[%s89_s4] sm:$0xff]  ;;  %v104_v1 = vld [vmem:[%s89_s4 + $0x8] sm:$0xff]  ;;  %v106_v2 = vld [vmem:[%s89_s4 + $0x10] sm:$0xff] }
  0x13   : > { %103 = vst [vmem:[%s87_s5] sm:$0xff] %v102_v0  ;;  %105 = vst [vmem:[%s87_s5 + $0x8] sm:$0xff] %v104_v1  ;;  %v108_v3 = vld [vmem:[%s89_s4 + $0x18] sm:$0xff] }
  0x14   : > { %107 = vst [vmem:[%s87_s5 + $0x10] sm:$0xff] %v106_v2  ;;  %109 = vst [vmem:[%s87_s5 + $0x18] sm:$0xff] %v108_v3 }
  0x15 PF: > { %p632_p8 = scmp.ge.s32.totalorder %s797_s15, 1  ;;  %p114_p9 = scmp.lt.s32.totalorder %s797_s15, 9 }
  0x17   : > { %p115_p10 = pnand %p632_p8, %p114_p9 }
  0x19   : > { %118 = sbr.rel (%p115_p10) target bundleno = 571 (0x23b), region = 39 }
  0x1e   : > { %s121_s6 = sand.u32 1, %s850_s16   ;;  %s136_s7 = sand.u32 1, %s789_s13   ;;  %v166_v4 = vlaneseq  ;;  %v807_v10 = vmov 0  }
  0x1f   : > { %s633_s8 = sshll.u32 %s121_s6, 5  ;;  %s887_s9 = sshll.u32 %s136_s7, 3 }
  0x20   : > { %v890_v5 = vshrl.u32 %v166_v4, 7  ;;  %s123_s10 = scalar_lea.vmem [#allocation0], %s633_s8  ;;  %s892_s11 = scalar_lea.vmem [#allocation1], %s633_s8 }
  0x21   : > { %v147_v6 = vld [vmem:[%s123_s10] sm:$0xff]  ;;  %v637_v7 = vld [vmem:[%s123_s10 + $0x8] sm:$0xff]  ;;  %v639_v8 = vld [vmem:[%s123_s10 + $0x10] sm:$0xff]  ;;  %s161_s17 = sand.u32 7, %s850_s16   ;;  %s138_s19 = scalar_lea.vmem [#allocation2], %s887_s9 }
  0x22   : > { %148 = vst [vmem:[%s892_s11] sm:$0xff] %v147_v6  ;;  %638 = vst [vmem:[%s892_s11 + $0x8] sm:$0xff] %v637_v7  ;;  %v641_v9 = vld [vmem:[%s123_s10 + $0x18] sm:$0xff]  ;;  %s902_s20 = scalar_lea.vmem %s138_s19, %s161_s17 [#allocation2]  ;;  %s144_s21 = scalar_lea.vmem [#allocation4], %s887_s9 }
  0x23   : > { %640 = vst [vmem:[%s892_s11 + $0x10] sm:$0xff] %v639_v8  ;;  %642 = vst [vmem:[%s892_s11 + $0x18] sm:$0xff] %v641_v9  ;;  %s907_s22 = scalar_lea.vmem %s144_s21, %s161_s17 [#allocation4]  ;;  %s799_s26 = smov 0  }
  0x24   : > { %165 = vst [vmem:[%s902_s20] sm:$0x1] %v807_v10 }
  0x25 LB: >> { %s643_s27 = sshll.u32 %s801_s26, 3  ;;  %s174_s26 = sadd.s32 1, %s801_s26   ;;  %s801_s26 = sphi %s799_s26, %s174_s26  }
  0x26   : >> { %v178_v11 = vstv %s643_s27  ;;  %s176_s28 = scalar_lea.vmem [#allocation5], %s643_s27  ;;  %p171_p11 = scmp.ge.s32.totalorder %s174_s26, 4  }
  0x27   : >> { %v179_v12 = vadd.s32 %v178_v11, %v890_v5  ;;  %s911_s29 = smov (%p171_p11), 0  }
  0x28   : > { %173 = sbr.rel (!%p171_p11) target bundleno = 37 (0x25), region = 203 }
  0x29   : >> { %180 = vst [vmem:[%s176_s28] sm:$0xff] %v179_v12 }
  0x2d LB: >> { %v191_v13 = vld [vmem:[%s892_s11] sm:$0xff]  ;;  %v646_v14 = vld [vmem:[%s892_s11 + $0x8] sm:$0xff]  ;;  %v919_v15 = vadd.s32 8, %v890_v5  ;;  %v922_v17 = vstv %s805_s29  ;;  %v647_v19 = vld [vmem:[%s892_s11 + $0x10] sm:$0xff]  ;;  %v928_v20 = vadd.s32 16, %v890_v5  ;;  %v936_v25 = vadd.s32 24, %v890_v5  ;;  %s285_s4 = scalar_lea.vmem %s892_s11, %s805_s29 [#allocation1]  ;;  %s805_s29 = sphi %s911_s29, %s186_s29  }
  0x2e   : >> { %v192_v16 = vand.u32 2147483647, %v191_v13  ;;  %v204_v18 = vand.u32 2147483647, %v646_v14  ;;  %vm195_vm0 = vcmp.ge.s32.totalorder %v890_v5, %v922_v17  ;;  %v216_v23 = vand.u32 2147483647, %v647_v19 }
  0x2f   : >> { %vm207_vm3 = vcmp.ge.s32.totalorder %v919_v15, %v922_v17  ;;  %v648_v24 = vld [vmem:[%s892_s11 + $0x18] sm:$0xff]  ;;  %vm219_vm6 = vcmp.ge.s32.totalorder %v928_v20, %v922_v17  ;;  %vm231_vm9 = vcmp.ge.s32.totalorder %v936_v25, %v922_v17  ;;  %s273_s30 = ssub.s32 128, %s805_s29  ;;  %v279_v61 = vand.u32 127, %v166_v4  ;;  %v282_v63 = vld [vmem:[%s902_s20] ss:$0 sm:$0xff]  ;;  %s291_s6 = scalar_lea.vmem [#allocation5], %s805_s29 }
  0x30   : >> { %vm645_vm1 = vcmp.gt.f32.partialorder %v192_v16, -inf  ;;  %v228_v28 = vand.u32 2147483647, %v648_v24  ;;  %v287_v0 = vld [vmem:[%s285_s4] ss:$0 sm:$0xff]  ;;  %s186_s29 = sadd.s32 1, %s805_s29  }
  0x31   : >> { %vm199_vm2 = vmand %vm195_vm0, %vm645_vm1  ;;  %v293_v1 = vld [vmem:[%s291_s6] ss:$0 sm:$0xff]  ;;  %p183_p12 = scmp.ge.s32.totalorder %s186_s29, 32  }
  0x32   : >> { %v200_v21 = vsel %vm199_vm2, %v890_v5, %v922_v17  ;;  %v201_v22 = vsel %vm199_vm2, %v192_v16, -inf  ;;  %s658_s17 = sshll.u32 (%p183_p12), %s850_s16, 5  ;;  %s460_s29 = sshrl.u32 (%p183_p12), %s850_s16, 3 }
  0x33   : >> { %vm210_vm4 = vcmp.lt.f32.partialorder %v201_v22, %v204_v18  ;;  %s433_s28 = scalar_lea.vmem (%p183_p12), %s1072_s1, %s658_s17  ;;  %s808_s17 = smov (%p183_p12), [#allocation2]  }
  0x34   : >> { %vm211_vm5 = vmand %vm207_vm3, %vm210_vm4  ;;  %vm950_vm3 = vcmp.eq.s32.totalorder %v279_v61, %v922_v17 }
  0x35   : >> { %v212_v26 = vsel %vm211_vm5, %v919_v15, %v200_v21  ;;  %v213_v27 = vsel %vm211_vm5, %v204_v18, %v201_v22  ;;  %vm326_vm5 = vcmp.gt.s32.totalorder %v919_v15, %v922_v17 }
  0x36   : >> { %vm222_vm7 = vcmp.lt.f32.partialorder %v213_v27, %v216_v23 }
  0x37   : >> { %vm223_vm8 = vmand %vm219_vm6, %vm222_vm7  ;;  %vm311_vm6 = vcmp.gt.s32.totalorder %v890_v5, %v922_v17  ;;  %vm341_vm7 = vcmp.gt.s32.totalorder %v928_v20, %v922_v17 }
  0x38   : >> { %v224_v29 = vsel %vm223_vm8, %v928_v20, %v212_v26  ;;  %v225_v30 = vsel %vm223_vm8, %v216_v23, %v213_v27 }
  0x39   : >> { %vm234_vm10 = vcmp.lt.f32.partialorder %v225_v30, %v228_v28 }
  0x3a   : >> { %vm235_vm11 = vmand %vm231_vm9, %vm234_vm10  ;;  %vm356_vm9 = vcmp.gt.s32.totalorder %v936_v25, %v922_v17 }
  0x3b   : >> { %v236_v31 = vsel %vm235_vm11, %v936_v25, %v224_v29  ;;  %v237_v32 = vsel %vm235_vm11, %v228_v28, %v225_v30  ;;  %vm330_vm10 = vmand %vm326_vm5, %vm950_vm3 }
  0x3c   : >> { %v238_v33 = vrot.slane %v237_v32, 1  ;;  %v239_v34 = vrot.slane %v236_v31, 1  ;;  %vm315_vm11 = vmand %vm311_vm6, %vm950_vm3 }
  0x3e   : >> { %vm240_vm12 = vcmp.ge.f32.partialorder %v238_v33, %v237_v32  ;;  %v243_v35 = vrot.slane %v238_v33, 1  ;;  %v244_v36 = vrot.slane %v239_v34, 1 }
  0x3f   : >> { %v241_v37 = vsel %vm240_vm12, %v238_v33, %v237_v32  ;;  %v242_v38 = vsel %vm240_vm12, %v239_v34, %v236_v31  ;;  %vm345_vm12 = vmand %vm341_vm7, %vm950_vm3 }
  0x40   : >> { %vm245_vm13 = vcmp.ge.f32.partialorder %v243_v35, %v241_v37  ;;  %v248_v39 = vrot.slane %v243_v35, 1  ;;  %v249_v40 = vrot.slane %v244_v36, 1 }
  0x41   : >> { %v246_v41 = vsel %vm245_vm13, %v243_v35, %v241_v37  ;;  %v247_v42 = vsel %vm245_vm13, %v244_v36, %v242_v38  ;;  %vm360_vm13 = vmand %vm356_vm9, %vm950_vm3 }
  0x42   : >> { %vm250_vm14 = vcmp.ge.f32.partialorder %v248_v39, %v246_v41  ;;  %v253_v43 = vrot.slane %v248_v39, 1  ;;  %v254_v44 = vrot.slane %v249_v40, 1 }
  0x43   : >> { %v251_v45 = vsel %vm250_vm14, %v248_v39, %v246_v41  ;;  %v252_v46 = vsel %vm250_vm14, %v249_v40, %v247_v42  ;;  %vm303_vm14 = vcmp.gt.s32.totalorder %v279_v61, %v922_v17 }
  0x44   : >> { %vm255_vm15 = vcmp.ge.f32.partialorder %v253_v43, %v251_v45  ;;  %v258_v47 = vrot.slane %v253_v43, 1  ;;  %v259_v48 = vrot.slane %v254_v44, 1 }
  0x45   : >> { %v256_v49 = vsel %vm255_vm15, %v253_v43, %v251_v45  ;;  %v257_v50 = vsel %vm255_vm15, %v254_v44, %v252_v46 }
  0x46   : >> { %vm260_vm0 = vcmp.ge.f32.partialorder %v258_v47, %v256_v49  ;;  %v263_v51 = vrot.slane %v258_v47, 1  ;;  %v264_v52 = vrot.slane %v259_v48, 1 }
  0x47   : >> { %v261_v53 = vsel %vm260_vm0, %v258_v47, %v256_v49  ;;  %v262_v54 = vsel %vm260_vm0, %v259_v48, %v257_v50 }
  0x48   : >> { %vm265_vm1 = vcmp.ge.f32.partialorder %v263_v51, %v261_v53  ;;  %v268_v55 = vrot.slane %v263_v51, 1  ;;  %v269_v56 = vrot.slane %v264_v52, 1 }
  0x49   : >> { %v266_v57 = vsel %vm265_vm1, %v263_v51, %v261_v53  ;;  %v267_v58 = vsel %vm265_vm1, %v264_v52, %v262_v54 }
  0x4a   : >> { %vm270_vm2 = vcmp.ge.f32.partialorder %v268_v55, %v266_v57 }
  0x4b   : >> { %v272_v59 = vsel %vm270_vm2, %v269_v56, %v267_v58 }
  0x4c   : >> { %274 = vrot.lane.b32.xlu0 %v272_v59, %s273_s30  ;;  %s467_s30 = sshll.u32 (%p183_p12), %s138_s19, 4  ;;  %s468_s30 = int_to_ptr.vmem [resolvable:$true] %s467_s30 }
  0xbe   : >> { %v275_v60 = vpop.permute.xlu0 %274 }
  0xbf   : >> { %663 = vpush %v275_v60 }
  0xf0   : >> { %s664_s5 = spop %663 }
  0xf1   : >> { %v281_v2 = vstv %s664_s5  ;;  %s286_s8 = scalar_lea.vmem %s892_s11, %s664_s5 [#allocation1]  ;;  %s292_s10 = scalar_lea.vmem [#allocation5], %s664_s5 }
  0xf2   : >> { %v283_v3 = vsel %vm950_vm3, %v281_v2, %v282_v63  ;;  %v288_v6 = vld [vmem:[%s286_s8] ss:$0 sm:$0xff] }
  0xf3   : >> { %v294_v7 = vld [vmem:[%s292_s10] ss:$0 sm:$0xff]  ;;  %284 = vst [vmem:[%s902_s20] sm:$0x1] %v283_v3  ;;  %289 = vst [vmem:[%s286_s8] sm:$0x1] %v287_v0  ;;  %vm297_vm4 = vcmp.ne.f32.partialorder %v288_v6, 0.0  ;;  %v304_v20 = vsel %vm303_vm14, %v288_v6, 0.0 }
  0xf4   : >> { %295 = vst [vmem:[%s292_s10] sm:$0x1] %v293_v1  ;;  %290 = vst [vmem:[%s285_s4] sm:$0x1] %v288_v6  ;;  %s659_s20 = sshll.u32 (%p183_p12), %s460_s29, 7  ;;  %s424_s8 = scalar_lea.sflag (%p183_p12), [#allocation3], %s136_s7 }
  0xf5   : >> { %296 = vst [vmem:[%s291_s6] sm:$0x1] %v294_v7  ;;  %vm298_vm8 = vmand %vm950_vm3, %vm297_vm4  ;;  %s465_s6 = scalar_lea.hbm (%p183_p12), %s1073_s2, %s659_s20  ;;  %s729_s10 = scalar_lea.vmem (%p183_p12), %s468_s30, 128 }
  0xf6   : >> { %v299_v8 = vsel %vm298_vm8, %v288_v6, 1.0  ;;  %p730_p13 = scmp.ne.s32.totalorder (%p183_p12), %s468_s30, %s729_s10 }
  0xf7   : >> { %v327_v9 = vsel %vm326_vm5, %v299_v8, 1.0  ;;  %v312_v10 = vsel %vm311_vm6, %v299_v8, 1.0  ;;  %v342_v11 = vsel %vm341_vm7, %v299_v8, 1.0  ;;  %v357_v12 = vsel %vm356_vm9, %v299_v8, 1.0 }
  0xf8   : >> { %721 = vrcp.f32 %v327_v9  ;;  %p731_p0 = pnand (%p183_p12), %p730_p13, %p867_p5 }
  0xf9   : >> { %723 = vrcp.f32 %v312_v10 }
  0xfa   : >> { %725 = vrcp.f32 %v342_v11  ;;  %p732_p1 = pneg (%p183_p12), %p731_p0 }
  0xfb   : >> { %727 = vrcp.f32 %v357_v12  ;;  %v649_v14 = vld [vmem:[%s892_s11 + $0x8] sm:$0xff]  ;;  %v308_v19 = vld [vmem:[%s892_s11] sm:$0xff]  ;;  %v651_v23 = vld [vmem:[%s892_s11 + $0x10] sm:$0xff] }
  0xfc   : >> { %v653_v15 = vld [vmem:[%s892_s11 + $0x18] sm:$0xff]  ;;  %v367_v17 = vld [vmem:[#allocation5] sm:$0xff] (%p183_p12)  ;;  %v369_v4 = vld [vmem:[#allocation5 + $0x8] sm:$0xff] (%p183_p12) }
 0x105   : >> { %v722_v13 = vpop.eup %721 }
 0x106   : >> { %v724_v16 = vpop.eup %723  ;;  %v329_v18 = vmul.f32 %v722_v13, %v649_v14 }
 0x107   : >> { %v726_v21 = vpop.eup %725  ;;  %v314_v22 = vmul.f32 %v724_v16, %v308_v19 }
 0x108   : >> { %v331_v24 = vsel %vm330_vm10, %v329_v18, 0.0  ;;  %v344_v26 = vmul.f32 %v726_v21, %v651_v23  ;;  %v728_v27 = vpop.eup %727 }
 0x109   : >> { %332 = vadd.xlane.f32.xlu1 %v331_v24  ;;  %v316_v28 = vsel %vm315_vm11, %v314_v22, 0.0  ;;  %v359_v30 = vmul.f32 %v728_v27, %v653_v15 }
 0x10a   : >> { %317 = vadd.xlane.f32.xlu0 %v316_v28  ;;  %v346_v29 = vsel %vm345_vm12, %v344_v26, 0.0 }
 0x10b   : >> { %v361_v31 = vsel %vm360_vm13, %v359_v30, 0.0 }
 0x10d   : >> { %347 = vadd.xlane.f32.xlu1 %v346_v29 }
 0x111   : >> { %362 = vadd.xlane.f32.xlu1 %v361_v31 }
 0x137   : > { %386 = vxpose.xlu0.b32.start [1/4] (short) (narrow) (%p183_p12), %v367_v17, 8 }
 0x192   : >> { %v333_v32 = vpop.xlane.xlu1 %332 }
 0x193   : >> { %v334_v33 = vmul.f32 %v333_v32, %v304_v20  ;;  %v318_v34 = vpop.xlane.xlu0 %317 }
 0x194   : >> { %v319_v35 = vmul.f32 %v318_v34, %v304_v20 }
 0x195   : >> { %v335_v36 = vsub.f32 %v329_v18, %v334_v33 }
 0x196   : >> { %v320_v37 = vsub.f32 %v314_v22, %v319_v35  ;;  %v348_v38 = vpop.xlane.xlu1 %347 }
 0x197   : >> { %650 = vst [vmem:[%s892_s11 + $0x8] sm:$0xff] %v335_v36  ;;  %v349_v39 = vmul.f32 %v348_v38, %v304_v20 }
 0x198   : >> { %321 = vst [vmem:[%s892_s11] sm:$0xff] %v320_v37 }
 0x199   : >> { %v350_v40 = vsub.f32 %v344_v26, %v349_v39 }
 0x19a   : >> { %v363_v25 = vpop.xlane.xlu1 %362 }
 0x19b   : >> { %652 = vst [vmem:[%s892_s11 + $0x10] sm:$0xff] %v350_v40  ;;  %v364_v41 = vmul.f32 %v363_v25, %v304_v20 }
 0x19d   : >> { %v365_v42 = vsub.f32 %v359_v30, %v364_v41 }
 0x19e   : > { %v448_v44 = vld [vmem:[%s892_s11 + $0x8] sm:$0xff] (%p183_p12) }
 0x19f   : >> { %654 = vst [vmem:[%s892_s11 + $0x18] sm:$0xff] %v365_v42  ;;  %v446_v43 = vld [vmem:[%s892_s11] sm:$0xff] (%p183_p12)  ;;  %449 = vst [vmem:[%s433_s28 + $0x8] sm:$0xff] (%p183_p12), %v448_v44 }
 0x1a0   : > { %185 = sbr.rel (!%p183_p12) target bundleno = 45 (0x2d), region = 214  ;;  %447 = vst [vmem:[%s433_s28] sm:$0xff] (%p183_p12), %v446_v43 }
 0x1a2   : > { %v450_v5 = vld [vmem:[%s892_s11 + $0x10] sm:$0xff] (%p183_p12) }
 0x1a3   : > { %451 = vst [vmem:[%s433_s28 + $0x10] sm:$0xff] (%p183_p12), %v450_v5 }
 0x1a6   : > { %v452_v45 = vld [vmem:[%s892_s11 + $0x18] sm:$0xff]  ;;  %s733_s11 = sshll.u32 %s808_s17, 4  ;;  %s734_s11 = int_to_ptr.vmem [resolvable:$false] %s733_s11 }
 0x1a7   : > { %453 = vst [vmem:[%s433_s28 + $0x18] sm:$0xff] %v452_v45  ;;  %s735_s26 = scalar_lea.vmem %s734_s11, 256  ;;  %p736_p2 = scmp.lt.s32.totalorder %s468_s30, %s734_s11 }
 0x1a8   : > { %p737_p3 = scmp.lt.s32.totalorder %s735_s26, %s729_s10 }
 0x1aa   : > { %p738_p4 = por %p737_p3, %p736_p2 }
 0x1ac   : > { %p739_p7 = pnand %p738_p4, %p732_p1 }
 0x1ae   : > { %742 = shalt.err (!%p739_p7)
}
 0x1af   : > { %s743_s19 = scalar_lea.hbm %s465_s6, 128  ;;  %s747_s28 = scalar_lea.hbm %s1073_s2, 128 }
 0x1b0   : > { %p744_p8 = scmp.ne.s32.totalorder %s465_s6, %s743_s19  ;;  %p748_p11 = scmp.lt.s32.totalorder %s465_s6, %s1073_s2 }
 0x1b1   : > { %p749_p12 = scmp.lt.s32.totalorder %s747_s28, %s743_s19 }
 0x1b2   : > { %p745_p9 = pnand %p744_p8, %p867_p5 }
 0x1b3   : > { %p750_p13 = por %p749_p12, %p748_p11 }
 0x1b4   : > { %p746_p10 = pneg %p745_p9 }
 0x1b6   : > { %p751_p0 = pnand %p750_p13, %p746_p10 }
 0x1b8   : > { %754 = shalt.err (!%p751_p0)
}
 0x1b9   : > { %665 = dma.vmem_to_hbm [thread:$0]  (%p867_p5), %s468_s30, 128, %s465_s6, %s424_s8   ;;  %387 = vxpose.xlu0.b32.cont [2/4] (short) (narrow) %v369_v4, 8  ;;  %v371_v46 = vld [vmem:[#allocation5 + $0x10] sm:$0xff]  ;;  %v373_v47 = vld [vmem:[#allocation5 + $0x18] sm:$0xff] }
 0x1ba   : > { %s660_s5 = sshll.u32 (%p867_p5), %s460_s29, 3 }
 0x1bb   : > { %s476_s30 = scalar_lea.vmem (%p867_p5), %s1074_s3, %s660_s5 }
 0x1bd   : > { %388 = vxpose.xlu0.b32.cont [3/4] (short) (narrow) %v371_v46, 8 }
 0x1c1   : > { %389 = vxpose.xlu0.b32.end [4/4] (short) (narrow) %v373_v47, 8 }
 0x22e   : > { %473 = sbr.rel (!%p867_p5) target bundleno = 571 (0x23b), region = 80 }
 0x231   : > { %v402_v48 = vpop.trf.xlu0 }
 0x232   : > { %418 = vst [vmem:[%s907_s22] sm:$0x1] %v402_v48 }
 0x239   : > { %v505_v49 = vld [vmem:[%s144_s21] sm:$0xff] }
 0x23a   : > { %506 = vst [vmem:[%s476_s30] sm:$0xff] %v505_v49 }
 0x23b PF: > { %p671_p1 = scmp.ge.s32.totalorder %s797_s15, 2  ;;  %s522_s22 = sand.u32 1, %s785_s12  }
 0x23c   : > { %s523_s16 = scalar_lea.sflag [#allocation3], %s522_s22 }
 0x23d   : > { %p668_p5 = pnand %p671_p1, %p871_p6 }
 0x23f   : > { %p669_p2 = pneg %p668_p5 }
 0x241   : > { %780 = dma.done.wait (%p669_p2), %s523_s16, 128  }
 0x242   : > { %782 = vsyncadd (%p669_p2), %s523_s16, 4294967168  ;;  %p10_p3 = scmp.ge.s32.totalorder %s854_s18, 10   ;;  %s1079_s12 = smov %s789_s13 }
 0x243   : > { %s1080_s13 = smov %s793_s14  ;;  %s1081_s14 = smov %s865_s23 }
 0x244   : > { %s1082_s15 = smov %s854_s18  ;;  %12 = sbr.rel (!%p10_p3) target bundleno = 3 (0x3), region = 225 }
 0x249   :  { %535 = vsyncpa [#allocation3], 1 }
 0x24a   :  { %537 = vsyncpa [#allocation3 + $0x1], 1 }

// kernel: custom-call.10
= control target key start
LH: loop header
LB: loop body
LE: loop exit
PB: predicated region body
PF: predicated region fallthrough
CT: control target
= control target key end

     0   :  { %s956_s6 = smov 0   ;;  %s958_s7 = smov 0   ;;  %s1120_s0 = inlined_call_operand.vmem [shape: f32[8,1,32,32], index: 0, kind: input, shape index: {}]   ;;  %s1121_s1 = inlined_call_operand.vmem [shape: f32[8,1,32,32], index: 1, kind: output, shape index: {}]  }
   0x1   :  { %s960_s8 = smov 0  }
   0x2 LB: > { %s864_s9 = sadd.s32 4294967295, %s942_s8   ;;  %s33_s10 = sadd.s32 1, %s938_s7  ;;  %s942_s8 = sphi %s960_s8, %s7_s8   ;;  %s938_s7 = sphi %s958_s7, %s1123_s7   ;;  %s934_s6 = sphi %s956_s6, %s1122_s6  }
   0x3   : > { %p35_p0 = scmp.ge.s32.totalorder %s33_s10, 8  ;;  %p866_p1 = scmp.ge.s32.totalorder %s942_s8, 8 }
   0x4   : > { %s49_s11 = sand.u32 (!%p866_p1), 1, %s942_s8   ;;  %s884_s12 = sshll.u32 (!%p866_p1), %s938_s7, 5 }
   0x5   : > { %s1125_s10 = smov (%p35_p0, %s33_s10), 0  ;;  %47 = sbr.rel (%p866_p1) target bundleno = 13 (0xd), region = 16 }
   0x6   : > { %s867_s13 = sshll.u32 (!%p866_p1), %s49_s11, 5  ;;  %s58_s16 = scalar_lea.vmem (!%p866_p1), %s1120_s0, %s884_s12 }
   0x7   : > { %s51_s17 = scalar_lea.vmem (!%p866_p1), [#allocation0], %s867_s13 }
   0xa   : > { %v93_v0 = vld [vmem:[%s58_s16] sm:$0xff]  ;;  %v95_v1 = vld [vmem:[%s58_s16 + $0x8] sm:$0xff]  ;;  %v97_v2 = vld [vmem:[%s58_s16 + $0x10] sm:$0xff] }
   0xb   : > { %94 = vst [vmem:[%s51_s17] sm:$0xff] %v93_v0  ;;  %96 = vst [vmem:[%s51_s17 + $0x8] sm:$0xff] %v95_v1  ;;  %v99_v3 = vld [vmem:[%s58_s16 + $0x18] sm:$0xff] }
   0xc   : > { %98 = vst [vmem:[%s51_s17 + $0x10] sm:$0xff] %v97_v2  ;;  %100 = vst [vmem:[%s51_s17 + $0x18] sm:$0xff] %v99_v3 }
   0xd PF: > { %p870_p2 = scmp.ge.s32.totalorder %s942_s8, 1  ;;  %p105_p3 = scmp.lt.s32.totalorder %s942_s8, 9 }
   0xf   : > { %p106_p4 = pnand %p870_p2, %p105_p3 }
  0x11   : > { %109 = sbr.rel (%p106_p4) target bundleno = 4571 (0x11db), region = 54 }
  0x16   : > { %s112_s18 = sand.u32 1, %s864_s9   ;;  %v123_v4 = vlaneseq  ;;  %v944_v13 = vmov -1.0   ;;  %v945_v57 = vmov 0.0   ;;  %s885_s21 = sshll.u32 %s934_s6, 5 }
  0x17   : > { %s871_s19 = sshll.u32 %s112_s18, 5  ;;  %s755_s24 = scalar_lea.vmem %s1121_s1, %s885_s21 }
  0x18   : > { %v983_v5 = vand.u32 127, %v123_v4  ;;  %v985_v6 = vshrl.u32 %v123_v4, 7  ;;  %s987_s20 = scalar_lea.vmem [#allocation0], %s871_s19 }
  0x19   : > { %v130_v7 = vld [vmem:[%s987_s20] sm:$0xff]  ;;  %v873_v40 = vld [vmem:[%s987_s20 + $0x8] sm:$0xff] }
  0x1a   : > { %vm129_vm0 = vcmp.eq.s32.totalorder %v985_v6, %v983_v5  ;;  %vm125_vm1 = vcmp.lt.s32.totalorder %v983_v5, 32  ;;  %vm134_vm2 = vcmp.ge.s32.totalorder %v985_v6, %v983_v5  ;;  %vm196_vm4 = vcmp.eq.s32.totalorder %v983_v5, 0 }
  0x1b   : > { %v131_v8 = vsel %vm129_vm0, %v130_v7, 0.0  ;;  %vm135_vm3 = vmand %vm134_vm2, %vm125_vm1  ;;  %vm193_vm5 = vcmp.eq.s32.totalorder %v983_v5, %v985_v6  ;;  %v197_v14 = vsel %vm196_vm4, 1.0, %v944_v13  ;;  %vm225_vm6 = vcmp.eq.s32.totalorder %v983_v5, 1 }
  0x1c   : > { %132 = vadd.xlane.f32.xlu0 %v131_v8  ;;  %v136_v10 = vsel %vm135_vm3, %v130_v7, 0.0  ;;  %v198_v15 = vsel %vm193_vm5, %v197_v14, 0.0  ;;  %vm235_vm7 = vcmp.eq.s32.totalorder %v983_v5, 2  ;;  %vm245_vm8 = vcmp.eq.s32.totalorder %v983_v5, 3 }
  0x1d   : > { %vm255_vm9 = vcmp.eq.s32.totalorder %v983_v5, 4  ;;  %v144_v35 = vadd.s32 8, %v985_v6  ;;  %vm265_vm11 = vcmp.eq.s32.totalorder %v983_v5, 5  ;;  %vm275_vm14 = vcmp.eq.s32.totalorder %v983_v5, 6 }
  0x1e   : > { %vm285_vm0 = vcmp.eq.s32.totalorder %v983_v5, 7  ;;  %vm295_vm2 = vcmp.eq.s32.totalorder %v983_v5, 8  ;;  %vm309_vm3 = vcmp.eq.s32.totalorder %v983_v5, 9  ;;  %vm323_vm4 = vcmp.eq.s32.totalorder %v983_v5, 10 }
  0x1f   : > { %vm145_vm10 = vcmp.eq.s32.totalorder %v144_v35, %v983_v5  ;;  %vm150_vm12 = vcmp.ge.s32.totalorder %v144_v35, %v983_v5  ;;  %vm204_vm15 = vcmp.eq.s32.totalorder %v983_v5, %v144_v35  ;;  %vm337_vm5 = vcmp.eq.s32.totalorder %v983_v5, 11 }
  0x20   : > { %v147_v41 = vsel %vm145_vm10, %v873_v40, 0.0  ;;  %vm151_vm13 = vmand %vm150_vm12, %vm125_vm1  ;;  %v205_v58 = vsel %vm204_vm15, -1.0, %v945_v57  ;;  %vm393_vm12 = vcmp.eq.s32.totalorder %v983_v5, 15  ;;  %vm425_vm15 = vcmp.eq.s32.totalorder %v983_v5, 17 }
  0x21   : > { %v152_v48 = vsel %vm151_vm13, %v873_v40, 0.0 }
  0xa5   : > { %v992_v9 = vpop.xlane.xlu0 %132 }
  0xa6   : > { %912 = vrcp.f32 %v992_v9 }
  0xb3   : > { %v1000_v11 = vpop.eup %912 }
  0xb4   : > { %v138_v12 = vmul.f32 %v1000_v11, %v136_v10 }
  0xb6   : > { %139 = vst [vmem:[#allocation2] sm:$0xff] %v138_v12 }
  0xbd   : > { %v221_v16 = vld [vmem:[#allocation2 + $0x1] ss:$0 sm:$0xff]  ;;  %v231_v19 = vld [vmem:[#allocation2 + $0x2] ss:$0 sm:$0xff]  ;;  %v241_v24 = vld [vmem:[#allocation2 + $0x3] ss:$0 sm:$0xff] }
  0xbe   : > { %v222_v17 = vxor.u32 2147483648, %v221_v16  ;;  %v232_v21 = vxor.u32 2147483648, %v231_v19  ;;  %v242_v26 = vxor.u32 2147483648, %v241_v24  ;;  %v251_v29 = vld [vmem:[#allocation2 + $0x4] ss:$0 sm:$0xff] }
  0xbf   : > { %v252_v31 = vxor.u32 2147483648, %v251_v29  ;;  %v261_v34 = vld [vmem:[#allocation2 + $0x5] ss:$0 sm:$0xff]  ;;  %v271_v42 = vld [vmem:[#allocation2 + $0x6] ss:$0 sm:$0xff] }
  0xc0   : > { %v226_v18 = vmul.f32 %v222_v17, %v198_v15  ;;  %v262_v37 = vxor.u32 2147483648, %v261_v34  ;;  %v272_v44 = vxor.u32 2147483648, %v271_v42  ;;  %v281_v51 = vld [vmem:[#allocation2 + $0x7] ss:$0 sm:$0xff] }
  0xc1   : > { %v282_v54 = vxor.u32 2147483648, %v281_v51  ;;  %v160_v51 = vadd.s32 16, %v985_v6 }
  0xc2   : > { %227 = vadd.xlane.f32.xlu0 %v226_v18 }
  0xc3   : > { %vm166_vm10 = vcmp.ge.s32.totalorder %v160_v51, %v983_v5  ;;  %vm211_vm13 = vcmp.eq.s32.totalorder %v983_v5, %v160_v51 }
 0x14b   : > { %v228_v20 = vpop.xlane.xlu0 %227 }
 0x14c   : > { %v229_v22 = vsel %vm225_vm6, %v228_v20, %v198_v15  ;;  %vm351_vm6 = vcmp.eq.s32.totalorder %v983_v5, 12 }
 0x14d   : > { %v236_v23 = vmul.f32 %v232_v21, %v229_v22 }
 0x14f   : > { %237 = vadd.xlane.f32.xlu1 %v236_v23 }
 0x1d8   : > { %v238_v25 = vpop.xlane.xlu1 %237 }
 0x1d9   : > { %v239_v27 = vsel %vm235_vm7, %v238_v25, %v229_v22  ;;  %vm365_vm7 = vcmp.eq.s32.totalorder %v983_v5, 13 }
 0x1da   : > { %v246_v28 = vmul.f32 %v242_v26, %v239_v27 }
 0x1dc   : > { %247 = vadd.xlane.f32.xlu1 %v246_v28 }
 0x265   : > { %v248_v30 = vpop.xlane.xlu1 %247 }
 0x266   : > { %v249_v32 = vsel %vm245_vm8, %v248_v30, %v239_v27  ;;  %vm161_vm8 = vcmp.eq.s32.totalorder %v160_v51, %v983_v5 }
 0x267   : > { %v256_v33 = vmul.f32 %v252_v31, %v249_v32 }
 0x269   : > { %257 = vadd.xlane.f32.xlu0 %v256_v33 }
 0x2f2   : > { %v258_v36 = vpop.xlane.xlu0 %257 }
 0x2f3   : > { %v259_v38 = vsel %vm255_vm9, %v258_v36, %v249_v32  ;;  %vm379_vm9 = vcmp.eq.s32.totalorder %v983_v5, 14 }
 0x2f4   : > { %v266_v39 = vmul.f32 %v262_v37, %v259_v38 }
 0x2f6   : > { %267 = vadd.xlane.f32.xlu1 %v266_v39 }
 0x2fa   : > { %148 = vadd.xlane.f32.xlu1 %v147_v41 }
 0x37f   : > { %v268_v43 = vpop.xlane.xlu1 %267 }
 0x380   : > { %v269_v45 = vsel %vm265_vm11, %v268_v43, %v259_v38  ;;  %vm167_vm11 = vmand %vm166_vm10, %vm125_vm1  ;;  %vm551_vm10 = vcmp.eq.s32.totalorder %v983_v5, 24 }
 0x381   : > { %v276_v46 = vmul.f32 %v272_v44, %v269_v45 }
 0x383   : > { %277 = vadd.xlane.f32.xlu0 %v276_v46  ;;  %v1014_v47 = vpop.xlane.xlu1 %148 }
 0x384   : > { %914 = vrcp.f32 %v1014_v47 }
 0x391   : > { %v1020_v49 = vpop.eup %914 }
 0x392   : > { %v154_v50 = vmul.f32 %v1020_v49, %v152_v48 }
 0x394   : > { %155 = vst [vmem:[#allocation2 + $0x8] sm:$0xff] %v154_v50 }
 0x39b   : > { %v291_v52 = vld [vmem:[#allocation2 + $0x8] ss:$0 sm:$0xff]  ;;  %v305_v63 = vld [vmem:[#allocation2 + $0x9] ss:$0 sm:$0xff]  ;;  %v319_v10 = vld [vmem:[#allocation2 + $0xa] ss:$0 sm:$0xff] }
 0x39c   : > { %v292_v55 = vxor.u32 2147483648, %v291_v52  ;;  %v306_v2 = vxor.u32 2147483648, %v305_v63  ;;  %v320_v14 = vxor.u32 2147483648, %v319_v10  ;;  %v333_v19 = vld [vmem:[#allocation2 + $0xb] ss:$0 sm:$0xff] }
 0x39d   : > { %v334_v22 = vxor.u32 2147483648, %v333_v19  ;;  %v347_v27 = vld [vmem:[#allocation2 + $0xc] ss:$0 sm:$0xff]  ;;  %v361_v35 = vld [vmem:[#allocation2 + $0xd] ss:$0 sm:$0xff] }
 0x39e   : > { %v300_v60 = vmul.f32 %v292_v55, %v205_v58  ;;  %v348_v30 = vxor.u32 2147483648, %v347_v27  ;;  %v362_v38 = vxor.u32 2147483648, %v361_v35  ;;  %v375_v43 = vld [vmem:[#allocation2 + $0xe] ss:$0 sm:$0xff] }
 0x39f   : > { %v376_v46 = vxor.u32 2147483648, %v375_v43 }
 0x40c   : > { %v278_v53 = vpop.xlane.xlu0 %277 }
 0x40d   : > { %v279_v56 = vsel %vm275_vm14, %v278_v53, %v269_v45  ;;  %vm407_vm14 = vcmp.eq.s32.totalorder %v983_v5, 16 }
 0x40e   : > { %v286_v59 = vmul.f32 %v282_v54, %v279_v56 }
 0x410   : > { %287 = vadd.xlane.f32.xlu0 %v286_v59  ;;  %v389_v59 = vld [vmem:[#allocation2 + $0xf] ss:$0 sm:$0xff] }
 0x414   : > { %301 = vadd.xlane.f32.xlu0 %v300_v60 }
 0x499   : > { %v288_v61 = vpop.xlane.xlu0 %287 }
 0x49a   : > { %v289_v62 = vsel %vm285_vm0, %v288_v61, %v279_v56  ;;  %v390_v61 = vxor.u32 2147483648, %v389_v59  ;;  %vm443_vm0 = vcmp.eq.s32.totalorder %v983_v5, 18 }
 0x49b   : > { %v296_v0 = vmul.f32 %v292_v55, %v289_v62  ;;  %v874_v55 = vld [vmem:[%s987_s20 + $0x10] sm:$0xff] }
 0x49d   : > { %v302_v1 = vpop.xlane.xlu0 %301  ;;  %297 = vadd.xlane.f32.xlu1 %v296_v0 }
 0x49e   : > { %v303_v3 = vsel %vm295_vm2, %v302_v1, %v205_v58  ;;  %v163_v58 = vsel %vm161_vm8, %v874_v55, 0.0 }
 0x49f   : > { %v314_v4 = vmul.f32 %v306_v2, %v303_v3 }
 0x4a1   : > { %315 = vadd.xlane.f32.xlu0 %v314_v4 }
 0x526   : > { %v298_v7 = vpop.xlane.xlu1 %297 }
 0x527   : > { %v299_v8 = vsel %vm295_vm2, %v298_v7, %v289_v62  ;;  %vm461_vm2 = vcmp.eq.s32.totalorder %v983_v5, 19 }
 0x528   : > { %v310_v12 = vmul.f32 %v306_v2, %v299_v8 }
 0x52a   : > { %v316_v13 = vpop.xlane.xlu0 %315  ;;  %311 = vadd.xlane.f32.xlu1 %v310_v12 }
 0x52b   : > { %v317_v15 = vsel %vm309_vm3, %v316_v13, %v303_v3  ;;  %v168_v3 = vsel %vm167_vm11, %v874_v55, 0.0  ;;  %vm573_vm11 = vcmp.eq.s32.totalorder %v983_v5, 25 }
 0x52c   : > { %v328_v16 = vmul.f32 %v320_v14, %v317_v15 }
 0x52e   : > { %329 = vadd.xlane.f32.xlu0 %v328_v16 }
 0x5b3   : > { %v312_v17 = vpop.xlane.xlu1 %311 }
 0x5b4   : > { %v313_v18 = vsel %vm309_vm3, %v312_v17, %v299_v8  ;;  %vm479_vm3 = vcmp.eq.s32.totalorder %v983_v5, 20 }
 0x5b5   : > { %v324_v20 = vmul.f32 %v320_v14, %v313_v18 }
 0x5b7   : > { %v330_v21 = vpop.xlane.xlu0 %329  ;;  %325 = vadd.xlane.f32.xlu1 %v324_v20 }
 0x5b8   : > { %v331_v23 = vsel %vm323_vm4, %v330_v21, %v317_v15 }
 0x5b9   : > { %v342_v24 = vmul.f32 %v334_v22, %v331_v23 }
 0x5bb   : > { %343 = vadd.xlane.f32.xlu0 %v342_v24 }
 0x640   : > { %v326_v25 = vpop.xlane.xlu1 %325 }
 0x641   : > { %v327_v26 = vsel %vm323_vm4, %v326_v25, %v313_v18  ;;  %v212_v18 = vsel %vm211_vm13, -1.0, %v945_v57  ;;  %vm497_vm4 = vcmp.eq.s32.totalorder %v983_v5, 21  ;;  %vm617_vm13 = vcmp.eq.s32.totalorder %v983_v5, 27 }
 0x642   : > { %v338_v28 = vmul.f32 %v334_v22, %v327_v26 }
 0x644   : > { %v344_v29 = vpop.xlane.xlu0 %343  ;;  %339 = vadd.xlane.f32.xlu1 %v338_v28 }
 0x645   : > { %v345_v31 = vsel %vm337_vm5, %v344_v29, %v331_v23 }
 0x646   : > { %v356_v32 = vmul.f32 %v348_v30, %v345_v31 }
 0x648   : > { %357 = vadd.xlane.f32.xlu0 %v356_v32 }
 0x6cd   : > { %v340_v33 = vpop.xlane.xlu1 %339 }
 0x6ce   : > { %v341_v34 = vsel %vm337_vm5, %v340_v33, %v327_v26 }
 0x6cf   : > { %v352_v36 = vmul.f32 %v348_v30, %v341_v34 }
 0x6d1   : > { %v358_v37 = vpop.xlane.xlu0 %357  ;;  %353 = vadd.xlane.f32.xlu1 %v352_v36 }
 0x6d2   : > { %v359_v39 = vsel %vm351_vm6, %v358_v37, %v345_v31 }
 0x6d3   : > { %v370_v40 = vmul.f32 %v362_v38, %v359_v39 }
 0x6d5   : > { %371 = vadd.xlane.f32.xlu0 %v370_v40 }
 0x75a   : > { %v354_v41 = vpop.xlane.xlu1 %353 }
 0x75b   : > { %v355_v42 = vsel %vm351_vm6, %v354_v41, %v341_v34  ;;  %vm515_vm6 = vcmp.eq.s32.totalorder %v983_v5, 22 }
 0x75c   : > { %v366_v44 = vmul.f32 %v362_v38, %v355_v42 }
 0x75e   : > { %v372_v45 = vpop.xlane.xlu0 %371  ;;  %367 = vadd.xlane.f32.xlu1 %v366_v44 }
 0x75f   : > { %v373_v48 = vsel %vm365_vm7, %v372_v45, %v359_v39 }
 0x760   : > { %v384_v50 = vmul.f32 %v376_v46, %v373_v48 }
 0x762   : > { %385 = vadd.xlane.f32.xlu0 %v384_v50 }
 0x7e7   : > { %v368_v52 = vpop.xlane.xlu1 %367 }
 0x7e8   : > { %v369_v53 = vsel %vm365_vm7, %v368_v52, %v355_v42 }
 0x7e9   : > { %v380_v54 = vmul.f32 %v376_v46, %v369_v53 }
 0x7eb   : > { %v386_v56 = vpop.xlane.xlu0 %385  ;;  %381 = vadd.xlane.f32.xlu1 %v380_v54 }
 0x7ec   : > { %v387_v60 = vsel %vm379_vm9, %v386_v56, %v373_v48 }
 0x7ed   : > { %v398_v62 = vmul.f32 %v390_v61, %v387_v60 }
 0x7ef   : > { %164 = vadd.xlane.f32.xlu1 %v163_v58 }
 0x7f3   : > { %399 = vadd.xlane.f32.xlu1 %v398_v62 }
 0x874   : > { %v382_v63 = vpop.xlane.xlu1 %381 }
 0x875   : > { %v383_v0 = vsel %vm379_vm9, %v382_v63, %v369_v53 }
 0x876   : > { %v394_v1 = vmul.f32 %v390_v61, %v383_v0 }
 0x878   : > { %395 = vadd.xlane.f32.xlu0 %v394_v1  ;;  %v1037_v2 = vpop.xlane.xlu1 %164 }
 0x879   : > { %916 = vrcp.f32 %v1037_v2 }
 0x87c   : > { %v400_v8 = vpop.xlane.xlu1 %399 }
 0x87d   : > { %v401_v13 = vsel %vm393_vm12, %v400_v8, %v387_v60 }
 0x886   : > { %v1043_v4 = vpop.eup %916 }
 0x887   : > { %v170_v7 = vmul.f32 %v1043_v4, %v168_v3 }
 0x889   : > { %171 = vst [vmem:[#allocation2 + $0x10] sm:$0xff] %v170_v7 }
 0x890   : > { %v403_v10 = vld [vmem:[#allocation2 + $0x10] ss:$0 sm:$0xff]  ;;  %v421_v20 = vld [vmem:[#allocation2 + $0x11] ss:$0 sm:$0xff]  ;;  %v439_v31 = vld [vmem:[#allocation2 + $0x12] ss:$0 sm:$0xff] }
 0x891   : > { %v404_v12 = vxor.u32 2147483648, %v403_v10  ;;  %v422_v22 = vxor.u32 2147483648, %v421_v20  ;;  %v440_v33 = vxor.u32 2147483648, %v439_v31  ;;  %v457_v42 = vld [vmem:[#allocation2 + $0x13] ss:$0 sm:$0xff] }
 0x892   : > { %v458_v44 = vxor.u32 2147483648, %v457_v42  ;;  %v475_v55 = vld [vmem:[#allocation2 + $0x14] ss:$0 sm:$0xff]  ;;  %v493_v7 = vld [vmem:[#allocation2 + $0x15] ss:$0 sm:$0xff] }
 0x893   : > { %v412_v14 = vmul.f32 %v404_v12, %v401_v13  ;;  %v416_v19 = vmul.f32 %v404_v12, %v212_v18  ;;  %v476_v58 = vxor.u32 2147483648, %v475_v55  ;;  %v494_v10 = vxor.u32 2147483648, %v493_v7  ;;  %v511_v20 = vld [vmem:[#allocation2 + $0x16] ss:$0 sm:$0xff] }
 0x895   : > { %413 = vadd.xlane.f32.xlu1 %v412_v14 }
 0x901   : > { %v396_v15 = vpop.xlane.xlu0 %395 }
 0x902   : > { %v397_v16 = vsel %vm393_vm12, %v396_v15, %v383_v0  ;;  %vm595_vm12 = vcmp.eq.s32.totalorder %v983_v5, 26 }
 0x903   : > { %v408_v17 = vmul.f32 %v404_v12, %v397_v16 }
 0x905   : > { %409 = vadd.xlane.f32.xlu0 %v408_v17 }
 0x909   : > { %417 = vadd.xlane.f32.xlu0 %v416_v19 }
 0x91e   : > { %v414_v21 = vpop.xlane.xlu1 %413 }
 0x91f   : > { %v415_v23 = vsel %vm407_vm14, %v414_v21, %v401_v13  ;;  %v176_v21 = vadd.s32 24, %v985_v6 }
 0x920   : > { %v430_v24 = vmul.f32 %v422_v22, %v415_v23 }
 0x921   : > { %vm177_vm5 = vcmp.eq.s32.totalorder %v176_v21, %v983_v5  ;;  %vm182_vm7 = vcmp.ge.s32.totalorder %v176_v21, %v983_v5  ;;  %vm218_vm9 = vcmp.eq.s32.totalorder %v983_v5, %v176_v21 }
 0x922   : > { %431 = vadd.xlane.f32.xlu0 %v430_v24  ;;  %vm183_vm8 = vmand %vm182_vm7, %vm125_vm1  ;;  %vm533_vm1 = vcmp.eq.s32.totalorder %v983_v5, 23 }
 0x98e   : > { %v410_v25 = vpop.xlane.xlu0 %409 }
 0x98f   : > { %v411_v26 = vsel %vm407_vm14, %v410_v25, %v397_v16 }
 0x990   : > { %v426_v27 = vmul.f32 %v422_v22, %v411_v26 }
 0x992   : > { %v418_v28 = vpop.xlane.xlu0 %417  ;;  %427 = vadd.xlane.f32.xlu1 %v426_v27 }
 0x993   : > { %v419_v29 = vsel %vm407_vm14, %v418_v28, %v212_v18  ;;  %vm639_vm14 = vcmp.eq.s32.totalorder %v983_v5, 28 }
 0x994   : > { %v434_v30 = vmul.f32 %v422_v22, %v419_v29 }
 0x996   : > { %435 = vadd.xlane.f32.xlu1 %v434_v30 }
 0x9ab   : > { %v432_v32 = vpop.xlane.xlu0 %431 }
 0x9ac   : > { %v433_v34 = vsel %vm425_vm15, %v432_v32, %v415_v23  ;;  %v512_v23 = vxor.u32 2147483648, %v511_v20 }
 0x9ad   : > { %v448_v35 = vmul.f32 %v440_v33, %v433_v34 }
 0x9af   : > { %449 = vadd.xlane.f32.xlu1 %v448_v35 }
 0xa1b   : > { %v428_v36 = vpop.xlane.xlu1 %427 }
 0xa1c   : > { %v429_v37 = vsel %vm425_vm15, %v428_v36, %v411_v26  ;;  %v875_v26 = vld [vmem:[%s987_s20 + $0x18] sm:$0xff] }
 0xa1d   : > { %v444_v38 = vmul.f32 %v440_v33, %v429_v37  ;;  %v179_v27 = vsel %vm177_vm5, %v875_v26, 0.0  ;;  %vm724_vm5 = vweird.f32 %v992_v9 }
 0xa1f   : > { %445 = vadd.xlane.f32.xlu0 %v444_v38  ;;  %v436_v39 = vpop.xlane.xlu1 %435 }
 0xa20   : > { %v437_v40 = vsel %vm425_vm15, %v436_v39, %v419_v29  ;;  %v184_v39 = vsel %vm183_vm8, %v875_v26, 0.0  ;;  %vm661_vm15 = vcmp.eq.s32.totalorder %v983_v5, 29 }
 0xa21   : > { %v452_v41 = vmul.f32 %v440_v33, %v437_v40  ;;  %v529_v33 = vld [vmem:[#allocation2 + $0x17] ss:$0 sm:$0xff] }
 0xa22   : > { %v530_v35 = vxor.u32 2147483648, %v529_v33 }
 0xa23   : > { %453 = vadd.xlane.f32.xlu0 %v452_v41 }
 0xa38   : > { %v450_v43 = vpop.xlane.xlu1 %449 }
 0xa39   : > { %v451_v45 = vsel %vm443_vm0, %v450_v43, %v433_v34 }
 0xa3a   : > { %v466_v46 = vmul.f32 %v458_v44, %v451_v45 }
 0xa3c   : > { %467 = vadd.xlane.f32.xlu0 %v466_v46 }
 0xaa8   : > { %v446_v48 = vpop.xlane.xlu0 %445 }
 0xaa9   : > { %v447_v50 = vsel %vm443_vm0, %v446_v48, %v429_v37 }
 0xaaa   : > { %v462_v51 = vmul.f32 %v458_v44, %v447_v50 }
 0xaac   : > { %463 = vadd.xlane.f32.xlu1 %v462_v51  ;;  %v454_v52 = vpop.xlane.xlu0 %453 }
 0xaad   : > { %v455_v53 = vsel %vm443_vm0, %v454_v52, %v437_v40  ;;  %vm683_vm0 = vcmp.eq.s32.totalorder %v983_v5, 30 }
 0xaae   : > { %v470_v54 = vmul.f32 %v458_v44, %v455_v53 }
 0xab0   : > { %471 = vadd.xlane.f32.xlu1 %v470_v54  ;;  %v219_v54 = vsel %vm218_vm9, -1.0, %v945_v57 }
 0xac5   : > { %v468_v56 = vpop.xlane.xlu0 %467 }
 0xac6   : > { %v469_v59 = vsel %vm461_vm2, %v468_v56, %v451_v45 }
 0xac7   : > { %v484_v60 = vmul.f32 %v476_v58, %v469_v59 }
 0xac9   : > { %485 = vadd.xlane.f32.xlu1 %v484_v60 }
 0xb35   : > { %v464_v61 = vpop.xlane.xlu1 %463 }
 0xb36   : > { %v465_v62 = vsel %vm461_vm2, %v464_v61, %v447_v50 }
 0xb37   : > { %v480_v63 = vmul.f32 %v476_v58, %v465_v62 }
 0xb39   : > { %481 = vadd.xlane.f32.xlu0 %v480_v63  ;;  %v472_v0 = vpop.xlane.xlu1 %471 }
 0xb3a   : > { %v473_v1 = vsel %vm461_vm2, %v472_v0, %v455_v53  ;;  %vm705_vm2 = vcmp.eq.s32.totalorder %v983_v5, 31 }
 0xb3b   : > { %v488_v3 = vmul.f32 %v476_v58, %v473_v1 }
 0xb3d   : > { %489 = vadd.xlane.f32.xlu0 %v488_v3 }
 0xb52   : > { %v486_v8 = vpop.xlane.xlu1 %485 }
 0xb53   : > { %v487_v12 = vsel %vm479_vm3, %v486_v8, %v469_v59 }
 0xb54   : > { %v502_v13 = vmul.f32 %v494_v10, %v487_v12 }
 0xb56   : > { %503 = vadd.xlane.f32.xlu0 %v502_v13 }
 0xbc2   : > { %v482_v14 = vpop.xlane.xlu0 %481 }
 0xbc3   : > { %v483_v15 = vsel %vm479_vm3, %v482_v14, %v465_v62 }
 0xbc4   : > { %v498_v16 = vmul.f32 %v494_v10, %v483_v15 }
 0xbc6   : > { %499 = vadd.xlane.f32.xlu1 %v498_v16  ;;  %v490_v17 = vpop.xlane.xlu0 %489 }
 0xbc7   : > { %v491_v18 = vsel %vm479_vm3, %v490_v17, %v473_v1  ;;  %vm729_vm3 = vweird.f32 %v1014_v47 }
 0xbc8   : > { %v506_v19 = vmul.f32 %v494_v10, %v491_v18 }
 0xbca   : > { %507 = vadd.xlane.f32.xlu1 %v506_v19 }
 0xbdf   : > { %v504_v22 = vpop.xlane.xlu0 %503 }
 0xbe0   : > { %v505_v24 = vsel %vm497_vm4, %v504_v22, %v487_v12 }
 0xbe1   : > { %v520_v25 = vmul.f32 %v512_v23, %v505_v24 }
 0xbe3   : > { %521 = vadd.xlane.f32.xlu1 %v520_v25 }
 0xbe7   : > { %180 = vadd.xlane.f32.xlu1 %v179_v27 }
 0xc4f   : > { %v500_v28 = vpop.xlane.xlu1 %499 }
 0xc50   : > { %v501_v29 = vsel %vm497_vm4, %v500_v28, %v483_v15 }
 0xc51   : > { %v516_v30 = vmul.f32 %v512_v23, %v501_v29 }
 0xc53   : > { %517 = vadd.xlane.f32.xlu0 %v516_v30  ;;  %v508_v31 = vpop.xlane.xlu1 %507 }
 0xc54   : > { %v509_v6 = vsel %vm497_vm4, %v508_v31, %v491_v18 }
 0xc55   : > { %v524_v32 = vmul.f32 %v512_v23, %v509_v6 }
 0xc57   : > { %525 = vadd.xlane.f32.xlu0 %v524_v32 }
 0xc6c   : > { %v522_v34 = vpop.xlane.xlu1 %521 }
 0xc6d   : > { %v523_v36 = vsel %vm515_vm6, %v522_v34, %v505_v24 }
 0xc6e   : > { %v538_v37 = vmul.f32 %v530_v35, %v523_v36 }
 0xc70   : > { %539 = vadd.xlane.f32.xlu1 %v538_v37  ;;  %v1067_v38 = vpop.xlane.xlu1 %180 }
 0xc71   : > { %918 = vrcp.f32 %v1067_v38  ;;  %vm741_vm4 = vweird.f32 %v1067_v38 }
 0xc7e   : > { %v1073_v40 = vpop.eup %918 }
 0xc7f   : > { %v186_v41 = vmul.f32 %v1073_v40, %v184_v39 }
 0xc81   : > { %187 = vst [vmem:[#allocation2 + $0x18] sm:$0xff] %v186_v41 }
 0xc88   : > { %v547_v50 = vld [vmem:[#allocation2 + $0x18] ss:$0 sm:$0xff]  ;;  %v569_v0 = vld [vmem:[#allocation2 + $0x19] ss:$0 sm:$0xff]  ;;  %v591_v19 = vld [vmem:[#allocation2 + $0x1a] ss:$0 sm:$0xff] }
 0xc89   : > { %v548_v51 = vxor.u32 2147483648, %v547_v50  ;;  %v570_v3 = vxor.u32 2147483648, %v569_v0  ;;  %v592_v21 = vxor.u32 2147483648, %v591_v19  ;;  %v613_v32 = vld [vmem:[#allocation2 + $0x1b] ss:$0 sm:$0xff] }
 0xc8a   : > { %v614_v34 = vxor.u32 2147483648, %v613_v32  ;;  %v635_v50 = vld [vmem:[#allocation2 + $0x1c] ss:$0 sm:$0xff] }
 0xc8b   : > { %v564_v56 = vmul.f32 %v548_v51, %v219_v54 }
 0xcdc   : > { %v518_v42 = vpop.xlane.xlu0 %517 }
 0xcdd   : > { %v519_v43 = vsel %vm515_vm6, %v518_v42, %v501_v29 }
 0xcde   : > { %v534_v44 = vmul.f32 %v530_v35, %v519_v43 }
 0xce0   : > { %535 = vadd.xlane.f32.xlu0 %v534_v44  ;;  %v526_v45 = vpop.xlane.xlu0 %525 }
 0xce1   : > { %v527_v46 = vsel %vm515_vm6, %v526_v45, %v509_v6  ;;  %vm735_vm6 = vweird.f32 %v1037_v2 }
 0xce2   : > { %v542_v48 = vmul.f32 %v530_v35, %v527_v46 }
 0xce4   : > { %543 = vadd.xlane.f32.xlu0 %v542_v48 }
 0xcf9   : > { %v540_v52 = vpop.xlane.xlu1 %539 }
 0xcfa   : > { %v541_v53 = vsel %vm533_vm1, %v540_v52, %v523_v36  ;;  %v636_v52 = vxor.u32 2147483648, %v635_v50 }
 0xcfb   : > { %v556_v55 = vmul.f32 %v548_v51, %v541_v53 }
 0xcfd   : > { %557 = vadd.xlane.f32.xlu0 %v556_v55 }
 0xd01   : > { %565 = vadd.xlane.f32.xlu0 %v564_v56 }
 0xd69   : > { %v536_v58 = vpop.xlane.xlu0 %535 }
 0xd6a   : > { %v537_v59 = vsel %vm533_vm1, %v536_v58, %v519_v43 }
 0xd6b   : > { %v552_v60 = vmul.f32 %v548_v51, %v537_v59 }
 0xd6d   : > { %v544_v61 = vpop.xlane.xlu0 %543  ;;  %553 = vadd.xlane.f32.xlu1 %v552_v60 }
 0xd6e   : > { %v545_v62 = vsel %vm533_vm1, %v544_v61, %v527_v46 }
 0xd6f   : > { %v560_v63 = vmul.f32 %v548_v51, %v545_v62 }
 0xd71   : > { %561 = vadd.xlane.f32.xlu1 %v560_v63 }
 0xd86   : > { %v558_v1 = vpop.xlane.xlu0 %557 }
 0xd87   : > { %v559_v7 = vsel %vm551_vm10, %v558_v1, %v541_v53  ;;  %v657_v1 = vld [vmem:[#allocation2 + $0x1d] ss:$0 sm:$0xff] }
 0xd88   : > { %v578_v8 = vmul.f32 %v570_v3, %v559_v7 }
 0xd8a   : > { %579 = vadd.xlane.f32.xlu0 %v578_v8  ;;  %v566_v57 = vpop.xlane.xlu0 %565 }
 0xd8b   : > { %v567_v10 = vsel %vm551_vm10, %v566_v57, %v219_v54 }
 0xd8c   : > { %v586_v12 = vmul.f32 %v570_v3, %v567_v10 }
 0xd8e   : > { %587 = vadd.xlane.f32.xlu0 %v586_v12 }
 0xdf6   : > { %v554_v13 = vpop.xlane.xlu1 %553 }
 0xdf7   : > { %v555_v14 = vsel %vm551_vm10, %v554_v13, %v537_v59 }
 0xdf8   : > { %v574_v15 = vmul.f32 %v570_v3, %v555_v14 }
 0xdfa   : > { %575 = vadd.xlane.f32.xlu1 %v574_v15  ;;  %v562_v16 = vpop.xlane.xlu1 %561 }
 0xdfb   : > { %v563_v17 = vsel %vm551_vm10, %v562_v16, %v545_v62 }
 0xdfc   : > { %v582_v18 = vmul.f32 %v570_v3, %v563_v17 }
 0xdfe   : > { %583 = vadd.xlane.f32.xlu1 %v582_v18 }
 0xe13   : > { %v580_v20 = vpop.xlane.xlu0 %579 }
 0xe14   : > { %v581_v22 = vsel %vm573_vm11, %v580_v20, %v559_v7  ;;  %v658_v7 = vxor.u32 2147483648, %v657_v1  ;;  %v679_v20 = vld [vmem:[#allocation2 + $0x1e] ss:$0 sm:$0xff] }
 0xe15   : > { %v600_v23 = vmul.f32 %v592_v21, %v581_v22 }
 0xe17   : > { %601 = vadd.xlane.f32.xlu0 %v600_v23  ;;  %v588_v24 = vpop.xlane.xlu0 %587 }
 0xe18   : > { %v589_v25 = vsel %vm573_vm11, %v588_v24, %v567_v10 }
 0xe19   : > { %v608_v26 = vmul.f32 %v592_v21, %v589_v25 }
 0xe1b   : > { %609 = vadd.xlane.f32.xlu0 %v608_v26 }
 0xe83   : > { %v576_v27 = vpop.xlane.xlu1 %575 }
 0xe84   : > { %v577_v28 = vsel %vm573_vm11, %v576_v27, %v555_v14 }
 0xe85   : > { %v596_v29 = vmul.f32 %v592_v21, %v577_v28 }
 0xe87   : > { %597 = vadd.xlane.f32.xlu1 %v596_v29  ;;  %v584_v30 = vpop.xlane.xlu1 %583 }
 0xe88   : > { %v585_v31 = vsel %vm573_vm11, %v584_v30, %v563_v17 }
 0xe89   : > { %v604_v6 = vmul.f32 %v592_v21, %v585_v31 }
 0xe8b   : > { %605 = vadd.xlane.f32.xlu1 %v604_v6 }
 0xea0   : > { %v602_v33 = vpop.xlane.xlu0 %601 }
 0xea1   : > { %v603_v35 = vsel %vm595_vm12, %v602_v33, %v581_v22  ;;  %v680_v22 = vxor.u32 2147483648, %v679_v20  ;;  %v701_v33 = vld [vmem:[#allocation2 + $0x1f] ss:$0 sm:$0xff] }
 0xea2   : > { %v622_v36 = vmul.f32 %v614_v34, %v603_v35 }
 0xea4   : > { %623 = vadd.xlane.f32.xlu0 %v622_v36  ;;  %v610_v37 = vpop.xlane.xlu0 %609 }
 0xea5   : > { %v611_v39 = vsel %vm595_vm12, %v610_v37, %v589_v25 }
 0xea6   : > { %v630_v41 = vmul.f32 %v614_v34, %v611_v39 }
 0xea8   : > { %631 = vadd.xlane.f32.xlu0 %v630_v41 }
 0xf10   : > { %v598_v42 = vpop.xlane.xlu1 %597 }
 0xf11   : > { %v599_v43 = vsel %vm595_vm12, %v598_v42, %v577_v28 }
 0xf12   : > { %v618_v44 = vmul.f32 %v614_v34, %v599_v43 }
 0xf14   : > { %619 = vadd.xlane.f32.xlu1 %v618_v44  ;;  %v606_v45 = vpop.xlane.xlu1 %605 }
 0xf15   : > { %v607_v46 = vsel %vm595_vm12, %v606_v45, %v585_v31 }
 0xf16   : > { %v626_v48 = vmul.f32 %v614_v34, %v607_v46 }
 0xf18   : > { %627 = vadd.xlane.f32.xlu1 %v626_v48 }
 0xf2d   : > { %v624_v51 = vpop.xlane.xlu0 %623 }
 0xf2e   : > { %v625_v53 = vsel %vm617_vm13, %v624_v51, %v603_v35  ;;  %v702_v35 = vxor.u32 2147483648, %v701_v33 }
 0xf2f   : > { %v644_v54 = vmul.f32 %v636_v52, %v625_v53 }
 0xf31   : > { %645 = vadd.xlane.f32.xlu0 %v644_v54  ;;  %v632_v55 = vpop.xlane.xlu0 %631 }
 0xf32   : > { %v633_v56 = vsel %vm617_vm13, %v632_v55, %v611_v39 }
 0xf33   : > { %v652_v58 = vmul.f32 %v636_v52, %v633_v56 }
 0xf35   : > { %653 = vadd.xlane.f32.xlu0 %v652_v58 }
 0xf9d   : > { %v620_v59 = vpop.xlane.xlu1 %619 }
 0xf9e   : > { %v621_v60 = vsel %vm617_vm13, %v620_v59, %v599_v43 }
 0xf9f   : > { %v640_v61 = vmul.f32 %v636_v52, %v621_v60 }
 0xfa1   : > { %641 = vadd.xlane.f32.xlu1 %v640_v61  ;;  %v628_v62 = vpop.xlane.xlu1 %627 }
 0xfa2   : > { %v629_v63 = vsel %vm617_vm13, %v628_v62, %v607_v46 }
 0xfa3   : > { %v648_v0 = vmul.f32 %v636_v52, %v629_v63 }
 0xfa5   : > { %649 = vadd.xlane.f32.xlu1 %v648_v0 }
 0xfba   : > { %v646_v3 = vpop.xlane.xlu0 %645 }
 0xfbb   : > { %v647_v8 = vsel %vm639_vm14, %v646_v3, %v625_v53 }
 0xfbc   : > { %v666_v57 = vmul.f32 %v658_v7, %v647_v8 }
 0xfbe   : > { %667 = vadd.xlane.f32.xlu0 %v666_v57  ;;  %v654_v10 = vpop.xlane.xlu0 %653 }
 0xfbf   : > { %v655_v12 = vsel %vm639_vm14, %v654_v10, %v633_v56 }
 0xfc0   : > { %v674_v13 = vmul.f32 %v658_v7, %v655_v12 }
 0xfc2   : > { %675 = vadd.xlane.f32.xlu0 %v674_v13 }
0x102a   : > { %v642_v14 = vpop.xlane.xlu1 %641 }
0x102b   : > { %v643_v15 = vsel %vm639_vm14, %v642_v14, %v621_v60 }
0x102c   : > { %v662_v16 = vmul.f32 %v658_v7, %v643_v15 }
0x102e   : > { %663 = vadd.xlane.f32.xlu1 %v662_v16  ;;  %v650_v17 = vpop.xlane.xlu1 %649 }
0x102f   : > { %v651_v18 = vsel %vm639_vm14, %v650_v17, %v629_v63 }
0x1030   : > { %v670_v19 = vmul.f32 %v658_v7, %v651_v18 }
0x1032   : > { %671 = vadd.xlane.f32.xlu1 %v670_v19 }
0x1047   : > { %v668_v21 = vpop.xlane.xlu0 %667 }
0x1048   : > { %v669_v23 = vsel %vm661_vm15, %v668_v21, %v647_v8 }
0x1049   : > { %v688_v24 = vmul.f32 %v680_v22, %v669_v23 }
0x104b   : > { %689 = vadd.xlane.f32.xlu0 %v688_v24  ;;  %v676_v25 = vpop.xlane.xlu0 %675 }
0x104c   : > { %v677_v26 = vsel %vm661_vm15, %v676_v25, %v655_v12 }
0x104d   : > { %v696_v27 = vmul.f32 %v680_v22, %v677_v26 }
0x104f   : > { %697 = vadd.xlane.f32.xlu0 %v696_v27 }
0x10b7   : > { %v664_v28 = vpop.xlane.xlu1 %663 }
0x10b8   : > { %v665_v29 = vsel %vm661_vm15, %v664_v28, %v643_v15 }
0x10b9   : > { %v684_v30 = vmul.f32 %v680_v22, %v665_v29 }
0x10bb   : > { %685 = vadd.xlane.f32.xlu1 %v684_v30  ;;  %v672_v31 = vpop.xlane.xlu1 %671 }
0x10bc   : > { %v673_v6 = vsel %vm661_vm15, %v672_v31, %v651_v18 }
0x10bd   : > { %v692_v32 = vmul.f32 %v680_v22, %v673_v6 }
0x10bf   : > { %693 = vadd.xlane.f32.xlu1 %v692_v32 }
0x10d4   : > { %v690_v34 = vpop.xlane.xlu0 %689 }
0x10d5   : > { %v691_v36 = vsel %vm683_vm0, %v690_v34, %v669_v23 }
0x10d6   : > { %v710_v37 = vmul.f32 %v702_v35, %v691_v36 }
0x10d8   : > { %711 = vadd.xlane.f32.xlu0 %v710_v37  ;;  %v698_v39 = vpop.xlane.xlu0 %697 }
0x10d9   : > { %v699_v41 = vsel %vm683_vm0, %v698_v39, %v677_v26 }
0x10da   : > { %v718_v42 = vmul.f32 %v702_v35, %v699_v41 }
0x10dc   : > { %719 = vadd.xlane.f32.xlu0 %v718_v42 }
0x1144   : > { %v686_v43 = vpop.xlane.xlu1 %685 }
0x1145   : > { %v687_v44 = vsel %vm683_vm0, %v686_v43, %v665_v29 }
0x1146   : > { %v706_v45 = vmul.f32 %v702_v35, %v687_v44 }
0x1148   : > { %707 = vadd.xlane.f32.xlu1 %v706_v45  ;;  %v694_v46 = vpop.xlane.xlu1 %693 }
0x1149   : > { %v695_v48 = vsel %vm683_vm0, %v694_v46, %v673_v6 }
0x114a   : > { %v714_v50 = vmul.f32 %v702_v35, %v695_v48 }
0x114c   : > { %715 = vadd.xlane.f32.xlu1 %v714_v50 }
0x1161   : > { %v712_v51 = vpop.xlane.xlu0 %711 }
0x1162   : > { %v713_v52 = vsel %vm705_vm2, %v712_v51, %v691_v36 }
0x1163   : > { %v728_v53 = vmul.f32 %v1020_v49, %v713_v52 }
0x1165   : > { %v730_v54 = vsel %vm729_vm3, %v713_v52, %v728_v53  ;;  %v720_v55 = vpop.xlane.xlu0 %719 }
0x1166   : > { %793 = vst [vmem:[%s755_s24 + $0x8] sm:$0xff] %v730_v54  ;;  %v721_v56 = vsel %vm705_vm2, %v720_v55, %v699_v41 }
0x1167   : > { %v740_v58 = vmul.f32 %v1073_v40, %v721_v56 }
0x1169   : > { %v742_v59 = vsel %vm741_vm4, %v721_v56, %v740_v58 }
0x116a   : > { %797 = vst [vmem:[%s755_s24 + $0x18] sm:$0xff] %v742_v59 }
0x11d1   : > { %v708_v60 = vpop.xlane.xlu1 %707 }
0x11d2   : > { %v709_v61 = vsel %vm705_vm2, %v708_v60, %v687_v44 }
0x11d3   : > { %v723_v49 = vmul.f32 %v1000_v11, %v709_v61 }
0x11d5   : > { %v725_v47 = vsel %vm724_vm5, %v709_v61, %v723_v49  ;;  %v716_v62 = vpop.xlane.xlu1 %715 }
0x11d6   : > { %791 = vst [vmem:[%s755_s24] sm:$0xff] %v725_v47  ;;  %v717_v63 = vsel %vm705_vm2, %v716_v62, %v695_v48 }
0x11d7   : > { %v734_v40 = vmul.f32 %v1043_v4, %v717_v63 }
0x11d9   : > { %v736_v38 = vsel %vm735_vm6, %v717_v63, %v734_v40 }
0x11da   : > { %795 = vst [vmem:[%s755_s24 + $0x10] sm:$0xff] %v736_v38 }
0x11db PF: > { %s7_s8 = sadd.s32 1, %s942_s8   ;;  %s1122_s6 = smov %s938_s7 }
0x11dc   : > { %p4_p5 = scmp.ge.s32.totalorder %s7_s8, 10   ;;  %s1123_s7 = smov %s1125_s10 }
0x11de   :  { %6 = sbr.rel (!%p4_p5) target bundleno = 2 (0x2), region = 158 }

// kernel: custom-call.9
= control target key start
LH: loop header
LB: loop body
LE: loop exit
PB: predicated region body
PF: predicated region fallthrough
CT: control target
= control target key end

     0   :  { %s955_s6 = smov 0   ;;  %s957_s7 = smov 0   ;;  %s1239_s0 = inlined_call_operand.vmem [shape: f32[8,1,32,32], index: 0, kind: input, shape index: {}]   ;;  %s1240_s1 = inlined_call_operand.vmem [shape: f32[8,1,32,32], index: 1, kind: output, shape index: {}]  }
   0x1   :  { %s959_s8 = smov 0  }
   0x2 LB: > { %s863_s9 = sadd.s32 4294967295, %s941_s8   ;;  %s33_s10 = sadd.s32 1, %s937_s7  ;;  %s941_s8 = sphi %s959_s8, %s7_s8   ;;  %s937_s7 = sphi %s957_s7, %s1242_s7   ;;  %s933_s6 = sphi %s955_s6, %s1241_s6  }
   0x3   : > { %p35_p0 = scmp.ge.s32.totalorder %s33_s10, 8  ;;  %p865_p1 = scmp.ge.s32.totalorder %s941_s8, 8 }
   0x4   : > { %s49_s11 = sand.u32 (!%p865_p1), 1, %s941_s8   ;;  %s883_s12 = sshll.u32 (!%p865_p1), %s937_s7, 5 }
   0x5   : > { %s1244_s10 = smov (%p35_p0, %s33_s10), 0  ;;  %47 = sbr.rel (%p865_p1) target bundleno = 13 (0xd), region = 16 }
   0x6   : > { %s866_s13 = sshll.u32 (!%p865_p1), %s49_s11, 5  ;;  %s58_s16 = scalar_lea.vmem (!%p865_p1), %s1239_s0, %s883_s12 }
   0x7   : > { %s51_s17 = scalar_lea.vmem (!%p865_p1), [#allocation0], %s866_s13 }
   0xa   : > { %v93_v0 = vld [vmem:[%s58_s16] sm:$0xff]  ;;  %v95_v1 = vld [vmem:[%s58_s16 + $0x8] sm:$0xff]  ;;  %v97_v2 = vld [vmem:[%s58_s16 + $0x10] sm:$0xff] }
   0xb   : > { %94 = vst [vmem:[%s51_s17] sm:$0xff] %v93_v0  ;;  %96 = vst [vmem:[%s51_s17 + $0x8] sm:$0xff] %v95_v1  ;;  %v99_v3 = vld [vmem:[%s58_s16 + $0x18] sm:$0xff] }
   0xc   : > { %98 = vst [vmem:[%s51_s17 + $0x10] sm:$0xff] %v97_v2  ;;  %100 = vst [vmem:[%s51_s17 + $0x18] sm:$0xff] %v99_v3 }
   0xd PF: > { %p869_p2 = scmp.ge.s32.totalorder %s941_s8, 1  ;;  %p105_p3 = scmp.lt.s32.totalorder %s941_s8, 9 }
   0xf   : > { %p106_p4 = pnand %p869_p2, %p105_p3 }
  0x11   : > { %109 = sbr.rel (%p106_p4) target bundleno = 4569 (0x11d9), region = 54 }
  0x16   : > { %s112_s18 = sand.u32 1, %s863_s9   ;;  %v123_v4 = vlaneseq  ;;  %v943_v14 = vmov -1.0   ;;  %v944_v52 = vmov 0.0   ;;  %s884_s21 = sshll.u32 %s933_s6, 5 }
  0x17   : > { %s870_s19 = sshll.u32 %s112_s18, 5  ;;  %s754_s24 = scalar_lea.vmem %s1240_s1, %s884_s21 }
  0x18   : > { %v982_v5 = vand.u32 127, %v123_v4  ;;  %v984_v6 = vshrl.u32 %v123_v4, 7  ;;  %s988_s20 = scalar_lea.vmem [#allocation0], %s870_s19 }
  0x19   : > { %v874_v8 = vld [vmem:[%s988_s20 + $0x18] sm:$0xff]  ;;  %v873_v41 = vld [vmem:[%s988_s20 + $0x10] sm:$0xff] }
  0x1a   : > { %vm125_vm0 = vcmp.lt.s32.totalorder %v982_v5, 32  ;;  %v176_v7 = vadd.s32 24, %v984_v6  ;;  %vm217_vm4 = vcmp.eq.s32.totalorder %v982_v5, 31  ;;  %vm225_vm6 = vcmp.eq.s32.totalorder %v982_v5, 30 }
  0x1b   : > { %v218_v15 = vsel %vm217_vm4, 1.0, %v943_v14  ;;  %vm235_vm7 = vcmp.eq.s32.totalorder %v982_v5, 29  ;;  %vm245_vm8 = vcmp.eq.s32.totalorder %v982_v5, 28  ;;  %vm255_vm9 = vcmp.eq.s32.totalorder %v982_v5, 27 }
  0x1c   : > { %vm177_vm1 = vcmp.eq.s32.totalorder %v176_v7, %v982_v5  ;;  %vm182_vm2 = vcmp.le.s32.totalorder %v176_v7, %v982_v5  ;;  %vm214_vm5 = vcmp.eq.s32.totalorder %v982_v5, %v176_v7  ;;  %v160_v36 = vadd.s32 16, %v984_v6 }
  0x1d   : > { %v179_v9 = vsel %vm177_vm1, %v874_v8, 0.0  ;;  %vm183_vm3 = vmand %vm182_vm2, %vm125_vm0  ;;  %v219_v16 = vsel %vm214_vm5, %v218_v15, 0.0  ;;  %vm265_vm11 = vcmp.eq.s32.totalorder %v982_v5, 26  ;;  %vm275_vm15 = vcmp.eq.s32.totalorder %v982_v5, 25 }
  0x1e   : > { %v184_v10 = vsel %vm183_vm3, %v874_v8, 0.0  ;;  %180 = vadd.xlane.f32.xlu0 %v179_v9  ;;  %vm161_vm10 = vcmp.eq.s32.totalorder %v160_v36, %v982_v5  ;;  %vm166_vm12 = vcmp.le.s32.totalorder %v160_v36, %v982_v5  ;;  %vm207_vm14 = vcmp.eq.s32.totalorder %v982_v5, %v160_v36 }
  0x1f   : > { %v163_v42 = vsel %vm161_vm10, %v873_v41, 0.0  ;;  %vm167_vm13 = vmand %vm166_vm12, %vm125_vm0  ;;  %v208_v53 = vsel %vm207_vm14, -1.0, %v944_v52  ;;  %vm295_vm1 = vcmp.eq.s32.totalorder %v982_v5, 23  ;;  %vm285_vm2 = vcmp.eq.s32.totalorder %v982_v5, 24 }
  0x20   : > { %v168_v49 = vsel %vm167_vm13, %v873_v41, 0.0  ;;  %vm309_vm3 = vcmp.eq.s32.totalorder %v982_v5, 22  ;;  %vm323_vm4 = vcmp.eq.s32.totalorder %v982_v5, 21  ;;  %vm337_vm5 = vcmp.eq.s32.totalorder %v982_v5, 20 }
  0x21   : > { %vm393_vm13 = vcmp.eq.s32.totalorder %v982_v5, 16  ;;  %vm407_vm14 = vcmp.eq.s32.totalorder %v982_v5, 15 }
  0xa7   : > { %v995_v11 = vpop.xlane.xlu0 %180 }
  0xa8   : > { %911 = vrcp.f32 %v995_v11 }
  0xb5   : > { %v998_v12 = vpop.eup %911 }
  0xb6   : > { %v186_v13 = vmul.f32 %v998_v12, %v184_v10 }
  0xb8   : > { %187 = vst [vmem:[#allocation2 + $0x18] sm:$0xff] %v186_v13 }
  0xbf   : > { %v221_v17 = vld [vmem:[#allocation2 + $0x1e] ss:$0 sm:$0xff]  ;;  %v231_v20 = vld [vmem:[#allocation2 + $0x1d] ss:$0 sm:$0xff]  ;;  %v241_v25 = vld [vmem:[#allocation2 + $0x1c] ss:$0 sm:$0xff] }
  0xc0   : > { %v222_v18 = vxor.u32 2147483648, %v221_v17  ;;  %v232_v22 = vxor.u32 2147483648, %v231_v20  ;;  %v242_v27 = vxor.u32 2147483648, %v241_v25  ;;  %v251_v30 = vld [vmem:[#allocation2 + $0x1b] ss:$0 sm:$0xff] }
  0xc1   : > { %v252_v32 = vxor.u32 2147483648, %v251_v30  ;;  %v261_v35 = vld [vmem:[#allocation2 + $0x1a] ss:$0 sm:$0xff]  ;;  %v271_v43 = vld [vmem:[#allocation2 + $0x19] ss:$0 sm:$0xff] }
  0xc2   : > { %v226_v19 = vmul.f32 %v222_v18, %v219_v16  ;;  %v262_v38 = vxor.u32 2147483648, %v261_v35  ;;  %v272_v45 = vxor.u32 2147483648, %v271_v43  ;;  %v281_v57 = vld [vmem:[#allocation2 + $0x18] ss:$0 sm:$0xff]  ;;  %v144_v43 = vadd.s32 8, %v984_v6 }
  0xc3   : > { %v282_v59 = vxor.u32 2147483648, %v281_v57 }
  0xc4   : > { %227 = vadd.xlane.f32.xlu0 %v226_v19  ;;  %vm200_vm12 = vcmp.eq.s32.totalorder %v982_v5, %v144_v43 }
 0x14d   : > { %v228_v21 = vpop.xlane.xlu0 %227 }
 0x14e   : > { %v229_v23 = vsel %vm225_vm6, %v228_v21, %v219_v16  ;;  %vm351_vm6 = vcmp.eq.s32.totalorder %v982_v5, 19 }
 0x14f   : > { %v236_v24 = vmul.f32 %v232_v22, %v229_v23 }
 0x151   : > { %237 = vadd.xlane.f32.xlu1 %v236_v24 }
 0x1da   : > { %v238_v26 = vpop.xlane.xlu1 %237 }
 0x1db   : > { %v239_v28 = vsel %vm235_vm7, %v238_v26, %v229_v23  ;;  %vm365_vm7 = vcmp.eq.s32.totalorder %v982_v5, 18 }
 0x1dc   : > { %v246_v29 = vmul.f32 %v242_v27, %v239_v28 }
 0x1de   : > { %247 = vadd.xlane.f32.xlu1 %v246_v29 }
 0x267   : > { %v248_v31 = vpop.xlane.xlu1 %247 }
 0x268   : > { %v249_v33 = vsel %vm245_vm8, %v248_v31, %v239_v28  ;;  %vm145_vm8 = vcmp.eq.s32.totalorder %v144_v43, %v982_v5 }
 0x269   : > { %v256_v34 = vmul.f32 %v252_v32, %v249_v33 }
 0x26b   : > { %257 = vadd.xlane.f32.xlu0 %v256_v34 }
 0x2f4   : > { %v258_v37 = vpop.xlane.xlu0 %257 }
 0x2f5   : > { %v259_v39 = vsel %vm255_vm9, %v258_v37, %v249_v33  ;;  %vm150_vm9 = vcmp.le.s32.totalorder %v144_v43, %v982_v5 }
 0x2f6   : > { %v266_v40 = vmul.f32 %v262_v38, %v259_v39  ;;  %vm151_vm10 = vmand %vm150_vm9, %vm125_vm0  ;;  %vm193_vm9 = vcmp.eq.s32.totalorder %v982_v5, %v984_v6 }
 0x2f8   : > { %267 = vadd.xlane.f32.xlu1 %v266_v40 }
 0x2fc   : > { %164 = vadd.xlane.f32.xlu1 %v163_v42 }
 0x381   : > { %v268_v44 = vpop.xlane.xlu1 %267 }
 0x382   : > { %v269_v46 = vsel %vm265_vm11, %v268_v44, %v259_v39  ;;  %vm379_vm11 = vcmp.eq.s32.totalorder %v982_v5, 17 }
 0x383   : > { %v276_v47 = vmul.f32 %v272_v45, %v269_v46 }
 0x385   : > { %277 = vadd.xlane.f32.xlu0 %v276_v47  ;;  %v1011_v48 = vpop.xlane.xlu1 %164 }
 0x386   : > { %913 = vrcp.f32 %v1011_v48 }
 0x393   : > { %v1017_v50 = vpop.eup %913 }
 0x394   : > { %v170_v51 = vmul.f32 %v1017_v50, %v168_v49  ;;  %v872_v49 = vld [vmem:[%s988_s20 + $0x8] sm:$0xff] }
 0x396   : > { %171 = vst [vmem:[#allocation2 + $0x10] sm:$0xff] %v170_v51  ;;  %v147_v51 = vsel %vm145_vm8, %v872_v49, 0.0 }
 0x39d   : > { %v291_v54 = vld [vmem:[#allocation2 + $0x17] ss:$0 sm:$0xff]  ;;  %v305_v62 = vld [vmem:[#allocation2 + $0x16] ss:$0 sm:$0xff]  ;;  %v319_v8 = vld [vmem:[#allocation2 + $0x15] ss:$0 sm:$0xff] }
 0x39e   : > { %v292_v55 = vxor.u32 2147483648, %v291_v54  ;;  %v306_v63 = vxor.u32 2147483648, %v305_v62  ;;  %v320_v10 = vxor.u32 2147483648, %v319_v8  ;;  %v333_v18 = vld [vmem:[#allocation2 + $0x14] ss:$0 sm:$0xff] }
 0x39f   : > { %v334_v20 = vxor.u32 2147483648, %v333_v18  ;;  %v347_v26 = vld [vmem:[#allocation2 + $0x13] ss:$0 sm:$0xff]  ;;  %v361_v34 = vld [vmem:[#allocation2 + $0x12] ss:$0 sm:$0xff] }
 0x3a0   : > { %v296_v56 = vmul.f32 %v292_v55, %v208_v53  ;;  %v348_v28 = vxor.u32 2147483648, %v347_v26  ;;  %v362_v36 = vxor.u32 2147483648, %v361_v34  ;;  %v375_v42 = vld [vmem:[#allocation2 + $0x11] ss:$0 sm:$0xff] }
 0x3a1   : > { %v376_v45 = vxor.u32 2147483648, %v375_v42 }
 0x3a2   : > { %297 = vadd.xlane.f32.xlu1 %v296_v56 }
 0x40e   : > { %v278_v58 = vpop.xlane.xlu0 %277 }
 0x40f   : > { %v279_v60 = vsel %vm275_vm15, %v278_v58, %v269_v46  ;;  %v152_v58 = vsel %vm151_vm10, %v872_v49, 0.0  ;;  %vm425_vm15 = vcmp.eq.s32.totalorder %v982_v5, 14  ;;  %vm551_vm10 = vcmp.eq.s32.totalorder %v982_v5, 7 }
 0x410   : > { %v286_v61 = vmul.f32 %v282_v59, %v279_v60 }
 0x412   : > { %287 = vadd.xlane.f32.xlu0 %v286_v61 }
 0x42b   : > { %v298_v0 = vpop.xlane.xlu1 %297 }
 0x42c   : > { %v299_v1 = vsel %vm295_vm1, %v298_v0, %v208_v53 }
 0x42d   : > { %v310_v2 = vmul.f32 %v306_v63, %v299_v1 }
 0x42f   : > { %311 = vadd.xlane.f32.xlu1 %v310_v2 }
 0x49b   : > { %v288_v3 = vpop.xlane.xlu0 %287 }
 0x49c   : > { %v289_v4 = vsel %vm285_vm2, %v288_v3, %v279_v60  ;;  %vm461_vm2 = vcmp.eq.s32.totalorder %v982_v5, 12 }
 0x49d   : > { %v300_v7 = vmul.f32 %v292_v55, %v289_v4 }
 0x49f   : > { %301 = vadd.xlane.f32.xlu0 %v300_v7  ;;  %v201_v7 = vsel %vm200_vm12, -1.0, %v944_v52  ;;  %vm595_vm12 = vcmp.eq.s32.totalorder %v982_v5, 5 }
 0x4b8   : > { %v312_v9 = vpop.xlane.xlu1 %311 }
 0x4b9   : > { %v313_v13 = vsel %vm309_vm3, %v312_v9, %v299_v1 }
 0x4ba   : > { %v324_v14 = vmul.f32 %v320_v10, %v313_v13 }
 0x4bc   : > { %325 = vadd.xlane.f32.xlu1 %v324_v14 }
 0x528   : > { %v302_v15 = vpop.xlane.xlu0 %301 }
 0x529   : > { %v303_v16 = vsel %vm295_vm1, %v302_v15, %v289_v4  ;;  %vm443_vm1 = vcmp.eq.s32.totalorder %v982_v5, 13 }
 0x52a   : > { %v314_v17 = vmul.f32 %v306_v63, %v303_v16  ;;  %v389_v63 = vld [vmem:[#allocation2 + $0x10] ss:$0 sm:$0xff] }
 0x52b   : > { %v390_v3 = vxor.u32 2147483648, %v389_v63 }
 0x52c   : > { %315 = vadd.xlane.f32.xlu0 %v314_v17 }
 0x545   : > { %v326_v19 = vpop.xlane.xlu1 %325 }
 0x546   : > { %v327_v21 = vsel %vm323_vm4, %v326_v19, %v313_v13 }
 0x547   : > { %v338_v22 = vmul.f32 %v334_v20, %v327_v21 }
 0x549   : > { %339 = vadd.xlane.f32.xlu1 %v338_v22 }
 0x5b5   : > { %v316_v23 = vpop.xlane.xlu0 %315 }
 0x5b6   : > { %v317_v24 = vsel %vm309_vm3, %v316_v23, %v303_v16  ;;  %vm479_vm3 = vcmp.eq.s32.totalorder %v982_v5, 11 }
 0x5b7   : > { %v328_v25 = vmul.f32 %v320_v10, %v317_v24 }
 0x5b9   : > { %329 = vadd.xlane.f32.xlu0 %v328_v25 }
 0x5d2   : > { %v340_v27 = vpop.xlane.xlu1 %339 }
 0x5d3   : > { %v341_v29 = vsel %vm337_vm5, %v340_v27, %v327_v21 }
 0x5d4   : > { %v352_v30 = vmul.f32 %v348_v28, %v341_v29 }
 0x5d6   : > { %353 = vadd.xlane.f32.xlu1 %v352_v30 }
 0x642   : > { %v330_v31 = vpop.xlane.xlu0 %329 }
 0x643   : > { %v331_v32 = vsel %vm323_vm4, %v330_v31, %v317_v24  ;;  %vm497_vm4 = vcmp.eq.s32.totalorder %v982_v5, 10 }
 0x644   : > { %v342_v33 = vmul.f32 %v334_v20, %v331_v32 }
 0x646   : > { %343 = vadd.xlane.f32.xlu0 %v342_v33 }
 0x65f   : > { %v354_v35 = vpop.xlane.xlu1 %353 }
 0x660   : > { %v355_v37 = vsel %vm351_vm6, %v354_v35, %v341_v29 }
 0x661   : > { %v366_v38 = vmul.f32 %v362_v36, %v355_v37 }
 0x663   : > { %367 = vadd.xlane.f32.xlu1 %v366_v38 }
 0x6cf   : > { %v344_v39 = vpop.xlane.xlu0 %343 }
 0x6d0   : > { %v345_v40 = vsel %vm337_vm5, %v344_v39, %v331_v32  ;;  %vm129_vm5 = vcmp.eq.s32.totalorder %v984_v6, %v982_v5 }
 0x6d1   : > { %v356_v41 = vmul.f32 %v348_v28, %v345_v40 }
 0x6d3   : > { %357 = vadd.xlane.f32.xlu0 %v356_v41 }
 0x6ec   : > { %v368_v44 = vpop.xlane.xlu1 %367 }
 0x6ed   : > { %v369_v46 = vsel %vm365_vm7, %v368_v44, %v355_v37 }
 0x6ee   : > { %v380_v47 = vmul.f32 %v376_v45, %v369_v46 }
 0x6f0   : > { %381 = vadd.xlane.f32.xlu1 %v380_v47 }
 0x6f4   : > { %148 = vadd.xlane.f32.xlu1 %v147_v51 }
 0x75c   : > { %v358_v53 = vpop.xlane.xlu0 %357 }
 0x75d   : > { %v359_v54 = vsel %vm351_vm6, %v358_v53, %v345_v40  ;;  %vm515_vm6 = vcmp.eq.s32.totalorder %v982_v5, 9 }
 0x75e   : > { %v370_v55 = vmul.f32 %v362_v36, %v359_v54 }
 0x760   : > { %371 = vadd.xlane.f32.xlu0 %v370_v55 }
 0x779   : > { %v382_v56 = vpop.xlane.xlu1 %381 }
 0x77a   : > { %v383_v2 = vsel %vm379_vm11, %v382_v56, %v369_v46 }
 0x77b   : > { %v394_v8 = vmul.f32 %v390_v3, %v383_v2 }
 0x77d   : > { %v1055_v57 = vpop.xlane.xlu1 %148 }
 0x77e   : > { %915 = vrcp.f32 %v1055_v57 }
 0x78b   : > { %v1061_v59 = vpop.eup %915 }
 0x78c   : > { %v154_v60 = vmul.f32 %v1061_v59, %v152_v58 }
 0x78e   : > { %155 = vst [vmem:[#allocation2 + $0x8] sm:$0xff] %v154_v60 }
 0x795   : > { %v403_v0 = vld [vmem:[#allocation2 + $0xf] ss:$0 sm:$0xff]  ;;  %v421_v15 = vld [vmem:[#allocation2 + $0xe] ss:$0 sm:$0xff]  ;;  %v439_v28 = vld [vmem:[#allocation2 + $0xd] ss:$0 sm:$0xff] }
 0x796   : > { %v404_v4 = vxor.u32 2147483648, %v403_v0  ;;  %v422_v19 = vxor.u32 2147483648, %v421_v15  ;;  %v440_v31 = vxor.u32 2147483648, %v439_v28  ;;  %v457_v39 = vld [vmem:[#allocation2 + $0xc] ss:$0 sm:$0xff] }
 0x797   : > { %v458_v42 = vxor.u32 2147483648, %v457_v39  ;;  %v475_v53 = vld [vmem:[#allocation2 + $0xb] ss:$0 sm:$0xff] }
 0x798   : > { %v408_v9 = vmul.f32 %v404_v4, %v201_v7  ;;  %v476_v56 = vxor.u32 2147483648, %v475_v53 }
 0x7e9   : > { %v372_v61 = vpop.xlane.xlu0 %371 }
 0x7ea   : > { %v373_v62 = vsel %vm365_vm7, %v372_v61, %v359_v54  ;;  %vm134_vm7 = vcmp.le.s32.totalorder %v984_v6, %v982_v5 }
 0x7eb   : > { %v384_v1 = vmul.f32 %v376_v45, %v373_v62  ;;  %vm135_vm8 = vmand %vm134_vm7, %vm125_vm0  ;;  %vm533_vm0 = vcmp.eq.s32.totalorder %v982_v5, 8 }
 0x7ed   : > { %385 = vadd.xlane.f32.xlu0 %v384_v1 }
 0x7f1   : > { %395 = vadd.xlane.f32.xlu0 %v394_v8 }
 0x7f5   : > { %409 = vadd.xlane.f32.xlu0 %v408_v9 }
 0x876   : > { %v386_v10 = vpop.xlane.xlu0 %385 }
 0x877   : > { %v387_v13 = vsel %vm379_vm11, %v386_v10, %v373_v62  ;;  %vm573_vm11 = vcmp.eq.s32.totalorder %v982_v5, 6 }
 0x878   : > { %v398_v14 = vmul.f32 %v390_v3, %v387_v13 }
 0x87a   : > { %v396_v16 = vpop.xlane.xlu0 %395  ;;  %399 = vadd.xlane.f32.xlu1 %v398_v14 }
 0x87b   : > { %v397_v17 = vsel %vm393_vm13, %v396_v16, %v383_v2  ;;  %v493_v2 = vld [vmem:[#allocation2 + $0xa] ss:$0 sm:$0xff] }
 0x87c   : > { %v412_v18 = vmul.f32 %v404_v4, %v397_v17 }
 0x87e   : > { %413 = vadd.xlane.f32.xlu1 %v412_v18  ;;  %v410_v20 = vpop.xlane.xlu0 %409 }
 0x87f   : > { %v411_v21 = vsel %vm407_vm14, %v410_v20, %v201_v7  ;;  %v494_v7 = vxor.u32 2147483648, %v493_v2 }
 0x880   : > { %v426_v22 = vmul.f32 %v422_v19, %v411_v21 }
 0x882   : > { %427 = vadd.xlane.f32.xlu1 %v426_v22 }
 0x903   : > { %v400_v23 = vpop.xlane.xlu1 %399 }
 0x904   : > { %v401_v24 = vsel %vm393_vm13, %v400_v23, %v387_v13  ;;  %vm617_vm13 = vcmp.eq.s32.totalorder %v982_v5, 4 }
 0x905   : > { %v416_v25 = vmul.f32 %v404_v4, %v401_v24 }
 0x907   : > { %417 = vadd.xlane.f32.xlu0 %v416_v25  ;;  %v414_v26 = vpop.xlane.xlu1 %413 }
 0x908   : > { %v415_v27 = vsel %vm407_vm14, %v414_v26, %v397_v17  ;;  %v511_v17 = vld [vmem:[#allocation2 + $0x9] ss:$0 sm:$0xff] }
 0x909   : > { %v430_v29 = vmul.f32 %v422_v19, %v415_v27  ;;  %v512_v20 = vxor.u32 2147483648, %v511_v17 }
 0x90b   : > { %431 = vadd.xlane.f32.xlu0 %v430_v29  ;;  %v428_v30 = vpop.xlane.xlu1 %427  ;;  %v130_v29 = vld [vmem:[%s988_s20] sm:$0xff] }
 0x90c   : > { %v429_v32 = vsel %vm425_vm15, %v428_v30, %v411_v21  ;;  %v131_v30 = vsel %vm129_vm5, %v130_v29, 0.0  ;;  %vm728_vm5 = vweird.f32 %v1055_v57 }
 0x90d   : > { %v444_v33 = vmul.f32 %v440_v31, %v429_v32 }
 0x90f   : > { %445 = vadd.xlane.f32.xlu0 %v444_v33 }
 0x990   : > { %v418_v34 = vpop.xlane.xlu0 %417 }
 0x991   : > { %v419_v35 = vsel %vm407_vm14, %v418_v34, %v401_v24  ;;  %v529_v34 = vld [vmem:[#allocation2 + $0x8] ss:$0 sm:$0xff]  ;;  %vm639_vm14 = vcmp.eq.s32.totalorder %v982_v5, 3 }
 0x992   : > { %v434_v36 = vmul.f32 %v422_v19, %v419_v35 }
 0x994   : > { %435 = vadd.xlane.f32.xlu1 %v434_v36  ;;  %v432_v37 = vpop.xlane.xlu0 %431 }
 0x995   : > { %v433_v38 = vsel %vm425_vm15, %v432_v37, %v415_v27 }
 0x996   : > { %v448_v40 = vmul.f32 %v440_v31, %v433_v38 }
 0x998   : > { %449 = vadd.xlane.f32.xlu1 %v448_v40  ;;  %v446_v41 = vpop.xlane.xlu0 %445 }
 0x999   : > { %v447_v43 = vsel %vm443_vm1, %v446_v41, %v429_v32 }
 0x99a   : > { %v462_v44 = vmul.f32 %v458_v42, %v447_v43 }
 0x99c   : > { %463 = vadd.xlane.f32.xlu1 %v462_v44 }
 0xa1d   : > { %v436_v45 = vpop.xlane.xlu1 %435 }
 0xa1e   : > { %v437_v46 = vsel %vm425_vm15, %v436_v45, %v419_v35  ;;  %vm661_vm15 = vcmp.eq.s32.totalorder %v982_v5, 2 }
 0xa1f   : > { %v452_v47 = vmul.f32 %v440_v31, %v437_v46 }
 0xa21   : > { %453 = vadd.xlane.f32.xlu0 %v452_v47  ;;  %v450_v49 = vpop.xlane.xlu1 %449 }
 0xa22   : > { %v451_v51 = vsel %vm443_vm1, %v450_v49, %v433_v38  ;;  %v530_v38 = vxor.u32 2147483648, %v529_v34 }
 0xa23   : > { %v466_v54 = vmul.f32 %v458_v42, %v451_v51 }
 0xa25   : > { %467 = vadd.xlane.f32.xlu0 %v466_v54  ;;  %v464_v55 = vpop.xlane.xlu1 %463 }
 0xa26   : > { %v465_v58 = vsel %vm461_vm2, %v464_v55, %v447_v43  ;;  %v136_v43 = vsel %vm135_vm8, %v130_v29, 0.0 }
 0xa27   : > { %v480_v60 = vmul.f32 %v476_v56, %v465_v58 }
 0xa29   : > { %481 = vadd.xlane.f32.xlu0 %v480_v60 }
 0xaaa   : > { %v454_v61 = vpop.xlane.xlu0 %453 }
 0xaab   : > { %v455_v62 = vsel %vm443_vm1, %v454_v61, %v437_v46  ;;  %v194_v46 = vsel %vm193_vm9, -1.0, %v944_v52  ;;  %vm683_vm1 = vcmp.eq.s32.totalorder %v982_v5, 1 }
 0xaac   : > { %v470_v63 = vmul.f32 %v458_v42, %v455_v62 }
 0xaae   : > { %471 = vadd.xlane.f32.xlu1 %v470_v63  ;;  %v468_v0 = vpop.xlane.xlu0 %467 }
 0xaaf   : > { %v469_v1 = vsel %vm461_vm2, %v468_v0, %v451_v51 }
 0xab0   : > { %v484_v3 = vmul.f32 %v476_v56, %v469_v1 }
 0xab2   : > { %485 = vadd.xlane.f32.xlu1 %v484_v3  ;;  %v482_v4 = vpop.xlane.xlu0 %481 }
 0xab3   : > { %v483_v8 = vsel %vm479_vm3, %v482_v4, %v465_v58 }
 0xab4   : > { %v498_v9 = vmul.f32 %v494_v7, %v483_v8 }
 0xab6   : > { %499 = vadd.xlane.f32.xlu1 %v498_v9 }
 0xb37   : > { %v472_v10 = vpop.xlane.xlu1 %471 }
 0xb38   : > { %v473_v13 = vsel %vm461_vm2, %v472_v10, %v455_v62  ;;  %vm704_vm2 = vcmp.eq.s32.totalorder %v982_v5, 0 }
 0xb39   : > { %v488_v14 = vmul.f32 %v476_v56, %v473_v13 }
 0xb3b   : > { %489 = vadd.xlane.f32.xlu0 %v488_v14  ;;  %v486_v15 = vpop.xlane.xlu1 %485 }
 0xb3c   : > { %v487_v16 = vsel %vm479_vm3, %v486_v15, %v469_v1 }
 0xb3d   : > { %v502_v18 = vmul.f32 %v494_v7, %v487_v16 }
 0xb3f   : > { %503 = vadd.xlane.f32.xlu0 %v502_v18  ;;  %v500_v19 = vpop.xlane.xlu1 %499 }
 0xb40   : > { %v501_v21 = vsel %vm497_vm4, %v500_v19, %v483_v8 }
 0xb41   : > { %v516_v22 = vmul.f32 %v512_v20, %v501_v21 }
 0xb43   : > { %517 = vadd.xlane.f32.xlu0 %v516_v22 }
 0xbc4   : > { %v490_v23 = vpop.xlane.xlu0 %489 }
 0xbc5   : > { %v491_v24 = vsel %vm479_vm3, %v490_v23, %v473_v13 }
 0xbc6   : > { %v506_v25 = vmul.f32 %v494_v7, %v491_v24 }
 0xbc8   : > { %507 = vadd.xlane.f32.xlu1 %v506_v25  ;;  %v504_v26 = vpop.xlane.xlu0 %503 }
 0xbc9   : > { %v505_v27 = vsel %vm497_vm4, %v504_v26, %v487_v16 }
 0xbca   : > { %v520_v28 = vmul.f32 %v512_v20, %v505_v27 }
 0xbcc   : > { %521 = vadd.xlane.f32.xlu1 %v520_v28  ;;  %v518_v31 = vpop.xlane.xlu0 %517 }
 0xbcd   : > { %v519_v36 = vsel %vm515_vm6, %v518_v31, %v501_v21 }
 0xbce   : > { %v534_v40 = vmul.f32 %v530_v38, %v519_v36 }
 0xbd0   : > { %132 = vadd.xlane.f32.xlu1 %v131_v30 }
 0xc51   : > { %v508_v32 = vpop.xlane.xlu1 %507 }
 0xc52   : > { %v509_v33 = vsel %vm497_vm4, %v508_v32, %v491_v24  ;;  %vm734_vm4 = vweird.f32 %v1011_v48 }
 0xc53   : > { %v524_v35 = vmul.f32 %v512_v20, %v509_v33 }
 0xc55   : > { %525 = vadd.xlane.f32.xlu0 %v524_v35  ;;  %v522_v37 = vpop.xlane.xlu1 %521 }
 0xc56   : > { %v523_v39 = vsel %vm515_vm6, %v522_v37, %v505_v27 }
 0xc57   : > { %v538_v41 = vmul.f32 %v530_v38, %v523_v39 }
 0xc59   : > { %535 = vadd.xlane.f32.xlu0 %v534_v40  ;;  %539 = vadd.xlane.f32.xlu1 %v538_v41  ;;  %v1124_v42 = vpop.xlane.xlu1 %132 }
 0xc5a   : > { %917 = vrcp.f32 %v1124_v42  ;;  %vm723_vm3 = vweird.f32 %v1124_v42 }
 0xc67   : > { %v1131_v44 = vpop.eup %917 }
 0xc68   : > { %v138_v45 = vmul.f32 %v1131_v44, %v136_v43 }
 0xc6a   : > { %139 = vst [vmem:[#allocation2] sm:$0xff] %v138_v45 }
 0xc71   : > { %v547_v47 = vld [vmem:[#allocation2 + $0x7] ss:$0 sm:$0xff]  ;;  %v569_v62 = vld [vmem:[#allocation2 + $0x6] ss:$0 sm:$0xff]  ;;  %v591_v16 = vld [vmem:[#allocation2 + $0x5] ss:$0 sm:$0xff] }
 0xc72   : > { %v548_v49 = vxor.u32 2147483648, %v547_v47  ;;  %v570_v63 = vxor.u32 2147483648, %v569_v62  ;;  %v592_v18 = vxor.u32 2147483648, %v591_v16  ;;  %v613_v30 = vld [vmem:[#allocation2 + $0x4] ss:$0 sm:$0xff] }
 0xc73   : > { %v614_v32 = vxor.u32 2147483648, %v613_v30 }
 0xc74   : > { %v552_v51 = vmul.f32 %v548_v49, %v194_v46 }
 0xc76   : > { %553 = vadd.xlane.f32.xlu1 %v552_v51 }
 0xcde   : > { %v526_v53 = vpop.xlane.xlu0 %525 }
 0xcdf   : > { %v527_v54 = vsel %vm515_vm6, %v526_v53, %v509_v33  ;;  %vm740_vm6 = vweird.f32 %v995_v11 }
 0xce0   : > { %v542_v55 = vmul.f32 %v530_v38, %v527_v54 }
 0xce2   : > { %543 = vadd.xlane.f32.xlu0 %v542_v55  ;;  %v536_v56 = vpop.xlane.xlu0 %535  ;;  %v540_v58 = vpop.xlane.xlu1 %539 }
 0xce3   : > { %v537_v60 = vsel %vm533_vm0, %v536_v56, %v519_v36  ;;  %v541_v6 = vsel %vm533_vm0, %v540_v58, %v523_v39 }
 0xce4   : > { %v556_v52 = vmul.f32 %v548_v49, %v537_v60  ;;  %v560_v61 = vmul.f32 %v548_v49, %v541_v6 }
 0xce6   : > { %557 = vadd.xlane.f32.xlu0 %v556_v52  ;;  %561 = vadd.xlane.f32.xlu1 %v560_v61 }
 0xcff   : > { %v554_v0 = vpop.xlane.xlu1 %553 }
 0xd00   : > { %v555_v1 = vsel %vm551_vm10, %v554_v0, %v194_v46  ;;  %v635_v46 = vld [vmem:[#allocation2 + $0x3] ss:$0 sm:$0xff] }
 0xd01   : > { %v574_v2 = vmul.f32 %v570_v63, %v555_v1 }
 0xd03   : > { %575 = vadd.xlane.f32.xlu1 %v574_v2 }
 0xd6b   : > { %v544_v3 = vpop.xlane.xlu0 %543 }
 0xd6c   : > { %v545_v4 = vsel %vm533_vm0, %v544_v3, %v527_v54 }
 0xd6d   : > { %v564_v7 = vmul.f32 %v548_v49, %v545_v4  ;;  %v636_v49 = vxor.u32 2147483648, %v635_v46 }
 0xd6f   : > { %565 = vadd.xlane.f32.xlu0 %v564_v7  ;;  %v558_v8 = vpop.xlane.xlu0 %557  ;;  %v562_v9 = vpop.xlane.xlu1 %561 }
 0xd70   : > { %v559_v10 = vsel %vm551_vm10, %v558_v8, %v537_v60  ;;  %v563_v13 = vsel %vm551_vm10, %v562_v9, %v541_v6 }
 0xd71   : > { %v578_v14 = vmul.f32 %v570_v63, %v559_v10  ;;  %v582_v15 = vmul.f32 %v570_v63, %v563_v13 }
 0xd73   : > { %579 = vadd.xlane.f32.xlu0 %v578_v14  ;;  %583 = vadd.xlane.f32.xlu1 %v582_v15 }
 0xd8c   : > { %v576_v17 = vpop.xlane.xlu1 %575 }
 0xd8d   : > { %v577_v19 = vsel %vm573_vm11, %v576_v17, %v555_v1  ;;  %v679_v17 = vld [vmem:[#allocation2 + $0x1] ss:$0 sm:$0xff] }
 0xd8e   : > { %v596_v20 = vmul.f32 %v592_v18, %v577_v19 }
 0xd90   : > { %597 = vadd.xlane.f32.xlu1 %v596_v20 }
 0xdf8   : > { %v566_v21 = vpop.xlane.xlu0 %565 }
 0xdf9   : > { %v567_v22 = vsel %vm551_vm10, %v566_v21, %v545_v4 }
 0xdfa   : > { %v586_v23 = vmul.f32 %v570_v63, %v567_v22  ;;  %v657_v63 = vld [vmem:[#allocation2 + $0x2] ss:$0 sm:$0xff] }
 0xdfb   : > { %v658_v1 = vxor.u32 2147483648, %v657_v63 }
 0xdfc   : > { %587 = vadd.xlane.f32.xlu0 %v586_v23  ;;  %v580_v24 = vpop.xlane.xlu0 %579  ;;  %v584_v25 = vpop.xlane.xlu1 %583 }
 0xdfd   : > { %v581_v26 = vsel %vm573_vm11, %v580_v24, %v559_v10  ;;  %v585_v27 = vsel %vm573_vm11, %v584_v25, %v563_v13 }
 0xdfe   : > { %v600_v28 = vmul.f32 %v592_v18, %v581_v26  ;;  %v604_v29 = vmul.f32 %v592_v18, %v585_v27 }
 0xe00   : > { %601 = vadd.xlane.f32.xlu0 %v600_v28  ;;  %605 = vadd.xlane.f32.xlu1 %v604_v29 }
 0xe19   : > { %v598_v31 = vpop.xlane.xlu1 %597 }
 0xe1a   : > { %v599_v33 = vsel %vm595_vm12, %v598_v31, %v577_v19  ;;  %v680_v19 = vxor.u32 2147483648, %v679_v17  ;;  %v700_v31 = vld [vmem:[#allocation2] ss:$0 sm:$0xff] }
 0xe1b   : > { %v618_v34 = vmul.f32 %v614_v32, %v599_v33 }
 0xe1d   : > { %619 = vadd.xlane.f32.xlu1 %v618_v34 }
 0xe85   : > { %v588_v35 = vpop.xlane.xlu0 %587 }
 0xe86   : > { %v589_v36 = vsel %vm573_vm11, %v588_v35, %v567_v22 }
 0xe87   : > { %v608_v37 = vmul.f32 %v592_v18, %v589_v36 }
 0xe89   : > { %609 = vadd.xlane.f32.xlu0 %v608_v37  ;;  %v602_v38 = vpop.xlane.xlu0 %601  ;;  %v606_v39 = vpop.xlane.xlu1 %605 }
 0xe8a   : > { %v603_v40 = vsel %vm595_vm12, %v602_v38, %v581_v26  ;;  %v607_v41 = vsel %vm595_vm12, %v606_v39, %v585_v27 }
 0xe8b   : > { %v622_v43 = vmul.f32 %v614_v32, %v603_v40  ;;  %v626_v45 = vmul.f32 %v614_v32, %v607_v41 }
 0xe8d   : > { %623 = vadd.xlane.f32.xlu0 %v622_v43  ;;  %627 = vadd.xlane.f32.xlu1 %v626_v45 }
 0xea6   : > { %v620_v47 = vpop.xlane.xlu1 %619 }
 0xea7   : > { %v621_v51 = vsel %vm617_vm13, %v620_v47, %v599_v33  ;;  %v701_v33 = vxor.u32 2147483648, %v700_v31 }
 0xea8   : > { %v640_v53 = vmul.f32 %v636_v49, %v621_v51 }
 0xeaa   : > { %641 = vadd.xlane.f32.xlu1 %v640_v53 }
 0xf12   : > { %v610_v54 = vpop.xlane.xlu0 %609 }
 0xf13   : > { %v611_v55 = vsel %vm595_vm12, %v610_v54, %v589_v36 }
 0xf14   : > { %v630_v56 = vmul.f32 %v614_v32, %v611_v55 }
 0xf16   : > { %631 = vadd.xlane.f32.xlu0 %v630_v56  ;;  %v624_v58 = vpop.xlane.xlu0 %623  ;;  %v628_v60 = vpop.xlane.xlu1 %627 }
 0xf17   : > { %v625_v6 = vsel %vm617_vm13, %v624_v58, %v603_v40  ;;  %v629_v52 = vsel %vm617_vm13, %v628_v60, %v607_v41 }
 0xf18   : > { %v644_v61 = vmul.f32 %v636_v49, %v625_v6  ;;  %v648_v62 = vmul.f32 %v636_v49, %v629_v52 }
 0xf1a   : > { %645 = vadd.xlane.f32.xlu0 %v644_v61  ;;  %649 = vadd.xlane.f32.xlu1 %v648_v62 }
 0xf33   : > { %v642_v0 = vpop.xlane.xlu1 %641 }
 0xf34   : > { %v643_v2 = vsel %vm639_vm14, %v642_v0, %v621_v51 }
 0xf35   : > { %v662_v3 = vmul.f32 %v658_v1, %v643_v2 }
 0xf37   : > { %663 = vadd.xlane.f32.xlu1 %v662_v3 }
 0xf9f   : > { %v632_v4 = vpop.xlane.xlu0 %631 }
 0xfa0   : > { %v633_v7 = vsel %vm617_vm13, %v632_v4, %v611_v55 }
 0xfa1   : > { %v652_v8 = vmul.f32 %v636_v49, %v633_v7 }
 0xfa3   : > { %653 = vadd.xlane.f32.xlu0 %v652_v8  ;;  %v646_v9 = vpop.xlane.xlu0 %645  ;;  %v650_v10 = vpop.xlane.xlu1 %649 }
 0xfa4   : > { %v647_v13 = vsel %vm639_vm14, %v646_v9, %v625_v6  ;;  %v651_v14 = vsel %vm639_vm14, %v650_v10, %v629_v52 }
 0xfa5   : > { %v666_v15 = vmul.f32 %v658_v1, %v647_v13  ;;  %v670_v16 = vmul.f32 %v658_v1, %v651_v14 }
 0xfa7   : > { %667 = vadd.xlane.f32.xlu0 %v666_v15  ;;  %671 = vadd.xlane.f32.xlu1 %v670_v16 }
 0xfc0   : > { %v664_v18 = vpop.xlane.xlu1 %663 }
 0xfc1   : > { %v665_v20 = vsel %vm661_vm15, %v664_v18, %v643_v2 }
 0xfc2   : > { %v684_v21 = vmul.f32 %v680_v19, %v665_v20 }
 0xfc4   : > { %685 = vadd.xlane.f32.xlu1 %v684_v21 }
0x102c   : > { %v654_v22 = vpop.xlane.xlu0 %653 }
0x102d   : > { %v655_v23 = vsel %vm639_vm14, %v654_v22, %v633_v7 }
0x102e   : > { %v674_v24 = vmul.f32 %v658_v1, %v655_v23 }
0x1030   : > { %675 = vadd.xlane.f32.xlu0 %v674_v24  ;;  %v668_v25 = vpop.xlane.xlu0 %667  ;;  %v672_v26 = vpop.xlane.xlu1 %671 }
0x1031   : > { %v669_v27 = vsel %vm661_vm15, %v668_v25, %v647_v13  ;;  %v673_v28 = vsel %vm661_vm15, %v672_v26, %v651_v14 }
0x1032   : > { %v688_v29 = vmul.f32 %v680_v19, %v669_v27  ;;  %v692_v30 = vmul.f32 %v680_v19, %v673_v28 }
0x1034   : > { %689 = vadd.xlane.f32.xlu0 %v688_v29  ;;  %693 = vadd.xlane.f32.xlu1 %v692_v30 }
0x104d   : > { %v686_v32 = vpop.xlane.xlu1 %685 }
0x104e   : > { %v687_v34 = vsel %vm683_vm1, %v686_v32, %v665_v20 }
0x104f   : > { %v705_v35 = vmul.f32 %v701_v33, %v687_v34 }
0x1051   : > { %706 = vadd.xlane.f32.xlu1 %v705_v35 }
0x10b9   : > { %v676_v36 = vpop.xlane.xlu0 %675 }
0x10ba   : > { %v677_v37 = vsel %vm661_vm15, %v676_v36, %v655_v23 }
0x10bb   : > { %v696_v38 = vmul.f32 %v680_v19, %v677_v37 }
0x10bd   : > { %697 = vadd.xlane.f32.xlu0 %v696_v38  ;;  %v690_v39 = vpop.xlane.xlu0 %689  ;;  %v694_v40 = vpop.xlane.xlu1 %693 }
0x10be   : > { %v691_v41 = vsel %vm683_vm1, %v690_v39, %v669_v27  ;;  %v695_v43 = vsel %vm683_vm1, %v694_v40, %v673_v28 }
0x10bf   : > { %v709_v45 = vmul.f32 %v701_v33, %v691_v41  ;;  %v713_v46 = vmul.f32 %v701_v33, %v695_v43 }
0x10c1   : > { %710 = vadd.xlane.f32.xlu0 %v709_v45  ;;  %714 = vadd.xlane.f32.xlu1 %v713_v46 }
0x10da   : > { %v707_v47 = vpop.xlane.xlu1 %706 }
0x10db   : > { %v708_v49 = vsel %vm704_vm2, %v707_v47, %v687_v34 }
0x10dc   : > { %v722_v51 = vmul.f32 %v1131_v44, %v708_v49 }
0x10de   : > { %v724_v53 = vsel %vm723_vm3, %v708_v49, %v722_v51 }
0x10df   : > { %790 = vst [vmem:[%s754_s24] sm:$0xff] %v724_v53 }
0x1146   : > { %v698_v54 = vpop.xlane.xlu0 %697 }
0x1147   : > { %v699_v55 = vsel %vm683_vm1, %v698_v54, %v677_v37 }
0x1148   : > { %v717_v56 = vmul.f32 %v701_v33, %v699_v55 }
0x114a   : > { %718 = vadd.xlane.f32.xlu0 %v717_v56  ;;  %v711_v58 = vpop.xlane.xlu0 %710  ;;  %v715_v60 = vpop.xlane.xlu1 %714 }
0x114b   : > { %v712_v6 = vsel %vm704_vm2, %v711_v58, %v691_v41  ;;  %v716_v52 = vsel %vm704_vm2, %v715_v60, %v695_v43 }
0x114c   : > { %v727_v44 = vmul.f32 %v1061_v59, %v712_v6  ;;  %v733_v42 = vmul.f32 %v1017_v50, %v716_v52 }
0x114e   : > { %v729_v61 = vsel %vm728_vm5, %v712_v6, %v727_v44  ;;  %v735_v62 = vsel %vm734_vm4, %v716_v52, %v733_v42 }
0x114f   : > { %792 = vst [vmem:[%s754_s24 + $0x8] sm:$0xff] %v729_v61  ;;  %794 = vst [vmem:[%s754_s24 + $0x10] sm:$0xff] %v735_v62 }
0x11d3   : > { %v719_v63 = vpop.xlane.xlu0 %718 }
0x11d4   : > { %v720_v0 = vsel %vm704_vm2, %v719_v63, %v699_v55 }
0x11d5   : > { %v739_v1 = vmul.f32 %v998_v12, %v720_v0 }
0x11d7   : > { %v741_v2 = vsel %vm740_vm6, %v720_v0, %v739_v1 }
0x11d8   : > { %796 = vst [vmem:[%s754_s24 + $0x18] sm:$0xff] %v741_v2 }
0x11d9 PF: > { %s7_s8 = sadd.s32 1, %s941_s8   ;;  %s1241_s6 = smov %s937_s7 }
0x11da   : > { %p4_p5 = scmp.ge.s32.totalorder %s7_s8, 10   ;;  %s1242_s7 = smov %s1244_s10 }
0x11dc   :  { %6 = sbr.rel (!%p4_p5) target bundleno = 2 (0x2), region = 157 }

// kernel: _frn_forward.1
= control target key start
LH: loop header
LB: loop body
LE: loop exit
PB: predicated region body
PF: predicated region fallthrough
CT: control target
= control target key end

     0   :  { %v461_v4 = vmov 0.0   ;;  %s653_s0 = inlined_call_operand.<no memory space> [shape: f32[1], index: 0, kind: input, shape index: {}]   ;;  %s654_s1 = inlined_call_operand.vmem [shape: f32[56,32], index: 1, kind: input, shape index: {}]   ;;  %s655_s2 = inlined_call_operand.vmem [shape: f32[32,256], index: 2, kind: input, shape index: {}]   ;;  %s656_s3 = inlined_call_operand.vmem [shape: f32[2,56], index: 3, kind: input, shape index: {}]   ;;  %s657_s4 = inlined_call_operand.vmem [shape: f32[256,8], index: 4, kind: input, shape index: {}]   ;;  %s658_s5 = inlined_call_operand.hbm [shape: f32[2,8], index: 5, kind: output, shape index: {}]  }
   0x1   :  { %v36_v0 = vld [vmem:[%s655_s2 + $0x38] sm:$0xff]  ;;  %v35_v1 = vld [vmem:[%s655_s2 + $0x30] sm:$0xff]  ;;  %v34_v2 = vld [vmem:[%s655_s2 + $0x28] sm:$0xff]  ;;  %123 = vmatprep.mubr.f32.mxu1 %v461_v4 }
   0x2   :  { %83 = vmatprep.subr.mxu1 %v36_v0  ;;  %v33_v3 = vld [vmem:[%s655_s2 + $0x20] sm:$0xff]  ;;  %v32_v5 = vld [vmem:[%s655_s2 + $0x18] sm:$0xff]  ;;  %v31_v6 = vld [vmem:[%s655_s2 + $0x10] sm:$0xff] }
   0x3   :  { %84 = vmatpush1.msra.mxu1 %v35_v1  ;;  %v30_v7 = vld [vmem:[%s655_s2 + $0x8] sm:$0xff]  ;;  %v29_v8 = vld [vmem:[%s655_s2] sm:$0xff] }
   0x4   :  { %85 = vmatprep.subr.mxu1 %v34_v2 }
   0x5   :  { %86 = vmatpush1.msra.mxu1 %v33_v3 }
   0x6   :  { %87 = vmatprep.subr.mxu1 %v32_v5 }
   0x7   :  { %11 = vsyncpa [#allocation4], 0  ;;  %88 = vmatpush1.msra.mxu1 %v31_v6  ;;  %v22_v9 = vld [vmem:[%s654_s1] sm:$0xff]  ;;  %vm37_vm0 = vcmask 261120   ;;  %v23_v10 = vld [vmem:[%s654_s1 + $0x8] sm:$0xff]  ;;  %vm181_vm1 = vcmask 457728  }
   0x8   :  { %89 = vmatprep.subr.mxu1 %v30_v7  ;;  %v24_v11 = vld [vmem:[%s654_s1 + $0x10] sm:$0xff]  ;;  %v25_v12 = vld [vmem:[%s654_s1 + $0x18] sm:$0xff]  ;;  %v26_v13 = vld [vmem:[%s654_s1 + $0x20] sm:$0xff]  ;;  %vm362_vm2 = vcmask 58368  }
   0x9   :  { %90 = vmatpush1.msra.mxu1 %v29_v8  ;;  %v27_v14 = vld [vmem:[%s654_s1 + $0x28] sm:$0xff]  ;;  %v28_v15 = vld [vmem:[%s654_s1 + $0x30] sm:$0xff]  ;;  %v287_v16 = vld [vmem:[%s657_s4 + $0xf8] sm:$0xff] }
   0xa   :  { %390 = vmatmul.mubr.msk.f32.vlgmr.msra.gmra.mxu1 %vm37_vm0, %v22_v9  ;;  %v271_v17 = vld [vmem:[%s657_s4 + $0x78] sm:$0xff]  ;;  %v286_v18 = vld [vmem:[%s657_s4 + $0xf0] sm:$0xff]  ;;  %398 = vmatprep.subr.mxu0 %v287_v16  ;;  %v285_v20 = vld [vmem:[%s657_s4 + $0xe8] sm:$0xff] }
   0xb   :  { %129 = vmatprep.mubr.f32.mxu1 %v461_v4  ;;  %v270_v19 = vld [vmem:[%s657_s4 + $0x70] sm:$0xff]  ;;  %399 = vmatpush3.msra.mxu0 %v271_v17  ;;  %v269_v21 = vld [vmem:[%s657_s4 + $0x68] sm:$0xff]  ;;  %v284_v22 = vld [vmem:[%s657_s4 + $0xe0] sm:$0xff] }
   0xc   :  { %400 = vmatprep.subr.mxu0 %v286_v18  ;;  %v268_v23 = vld [vmem:[%s657_s4 + $0x60] sm:$0xff]  ;;  %v283_v24 = vld [vmem:[%s657_s4 + $0xd8] sm:$0xff]  ;;  %v282_v26 = vld [vmem:[%s657_s4 + $0xd0] sm:$0xff]  ;;  %v360_v18 = vstv %s653_s0 }
   0xd   :  { %401 = vmatpush3.msra.mxu0 %v270_v19  ;;  %v267_v25 = vld [vmem:[%s657_s4 + $0x58] sm:$0xff]  ;;  %v266_v27 = vld [vmem:[%s657_s4 + $0x50] sm:$0xff]  ;;  %v281_v28 = vld [vmem:[%s657_s4 + $0xc8] sm:$0xff] }
   0xe   :  { %391 = vmatmul.mubr.msk.f32.gmra.mxu1 %vm37_vm0, %v23_v10  ;;  %402 = vmatprep.subr.mxu0 %v285_v20  ;;  %v265_v29 = vld [vmem:[%s657_s4 + $0x48] sm:$0xff]  ;;  %v280_v30 = vld [vmem:[%s657_s4 + $0xc0] sm:$0xff]  ;;  %v279_v32 = vld [vmem:[%s657_s4 + $0xb8] sm:$0xff] }
   0xf   :  { %135 = vmatprep.mubr.f32.mxu1 %v461_v4  ;;  %403 = vmatpush3.msra.mxu0 %v269_v21  ;;  %v264_v31 = vld [vmem:[%s657_s4 + $0x40] sm:$0xff]  ;;  %v263_v33 = vld [vmem:[%s657_s4 + $0x38] sm:$0xff]  ;;  %v278_v34 = vld [vmem:[%s657_s4 + $0xb0] sm:$0xff] }
  0x10   :  { %404 = vmatprep.subr.mxu0 %v284_v22  ;;  %v262_v35 = vld [vmem:[%s657_s4 + $0x30] sm:$0xff]  ;;  %v277_v36 = vld [vmem:[%s657_s4 + $0xa8] sm:$0xff]  ;;  %v276_v38 = vld [vmem:[%s657_s4 + $0xa0] sm:$0xff] }
  0x11   :  { %405 = vmatpush3.msra.mxu0 %v268_v23  ;;  %v261_v37 = vld [vmem:[%s657_s4 + $0x28] sm:$0xff]  ;;  %v260_v39 = vld [vmem:[%s657_s4 + $0x20] sm:$0xff]  ;;  %v275_v40 = vld [vmem:[%s657_s4 + $0x98] sm:$0xff] }
  0x12   :  { %392 = vmatmul.mubr.msk.f32.gmra.mxu1 %vm37_vm0, %v24_v11  ;;  %406 = vmatprep.subr.mxu0 %v283_v24  ;;  %v259_v41 = vld [vmem:[%s657_s4 + $0x18] sm:$0xff]  ;;  %v274_v42 = vld [vmem:[%s657_s4 + $0x90] sm:$0xff]  ;;  %v180_v8 = vld [vmem:[%s656_s3] sm:$0x3] }
  0x13   :  { %141 = vmatprep.mubr.f32.mxu1 %v461_v4  ;;  %407 = vmatpush3.msra.mxu0 %v267_v25  ;;  %v258_v43 = vld [vmem:[%s657_s4 + $0x10] sm:$0xff]  ;;  %v273_v9 = vld [vmem:[%s657_s4 + $0x88] sm:$0xff]  ;;  %v272_v11 = vld [vmem:[%s657_s4 + $0x80] sm:$0xff] }
  0x14   :  { %408 = vmatprep.subr.mxu0 %v282_v26  ;;  %v257_v10 = vld [vmem:[%s657_s4 + $0x8] sm:$0xff] }
  0x15   :  { %409 = vmatpush3.msra.mxu0 %v266_v27 }
  0x16   :  { %393 = vmatmul.mubr.msk.f32.gmra.mxu1 %vm37_vm0, %v25_v12  ;;  %410 = vmatprep.subr.mxu0 %v281_v28  ;;  %v256_v12 = vld [vmem:[%s657_s4] sm:$0xff]  ;;  %s462_s4 = smov [#allocation3]  }
  0x17   :  { %147 = vmatprep.mubr.f32.mxu1 %v461_v4  ;;  %411 = vmatpush3.msra.mxu0 %v265_v29  ;;  %s382_s9 = sshll.u32 %s462_s4, 4  ;;  %s383_s9 = int_to_ptr.vmem [resolvable:$true] %s382_s9 }
  0x18   :  { %412 = vmatprep.subr.mxu0 %v280_v30  ;;  %s439_s0 = scalar_lea.vmem %s383_s9, 32  ;;  %p444_p1 = scmp.lt.s32.totalorder %s383_s9, %s383_s9 }
  0x19   :  { %413 = vmatpush3.msra.mxu0 %v264_v31  ;;  %p440_p0 = scmp.ne.s32.totalorder %s383_s9, %s439_s0  ;;  %p445_p2 = scmp.lt.s32.totalorder %s439_s0, %s439_s0 }
  0x1a   :  { %394 = vmatmul.mubr.msk.f32.gmra.mxu1 %vm37_vm0, %v26_v13  ;;  %414 = vmatprep.subr.mxu0 %v279_v32 }
  0x1b   :  { %153 = vmatprep.mubr.f32.mxu1 %v461_v4  ;;  %415 = vmatpush3.msra.mxu0 %v263_v33  ;;  %p446_p3 = por %p445_p2, %p444_p1 }
  0x1c   :  { %416 = vmatprep.subr.mxu0 %v278_v34 }
  0x1d   :  { %417 = vmatpush3.msra.mxu0 %v262_v35  ;;  %p447_p4 = pnand %p446_p3, %p440_p0 }
  0x1e   :  { %395 = vmatmul.mubr.msk.f32.gmra.mxu1 %vm37_vm0, %v27_v14  ;;  %418 = vmatprep.subr.mxu0 %v277_v36 }
  0x1f   :  { %159 = vmatprep.mubr.f32.mxu1 %v461_v4  ;;  %419 = vmatpush3.msra.mxu0 %v261_v37 }
  0x20   :  { %420 = vmatprep.subr.mxu0 %v276_v38 }
  0x21   :  { %421 = vmatpush3.msra.mxu0 %v260_v39 }
  0x22   :  { %396 = vmatmul.mubr.msk.f32.gmra.mxu1 %vm37_vm0, %v28_v15  ;;  %422 = vmatprep.subr.mxu0 %v275_v40 }
  0x23   :  { %249 = vmatprep.mubr.f32.mxu1 %v461_v4  ;;  %423 = vmatpush3.msra.mxu0 %v259_v41 }
  0x24   :  { %424 = vmatprep.subr.mxu0 %v274_v42 }
  0x25   :  { %425 = vmatpush3.msra.mxu0 %v258_v43 }
  0x26   :  { %426 = vmatprep.subr.mxu0 %v273_v9 }
  0x27   :  { %427 = vmatpush3.msra.mxu0 %v257_v10 }
  0x28   :  { %428 = vmatprep.subr.mxu0 %v272_v11 }
  0x29   :  { %429 = vmatpush3.msra.mxu0 %v256_v12 }
  0xca   :  { %v125_v44 = vpop.f32.mrf.mxu1 }
  0xcb   :  { %v166_v7 = vmul.f32 %v125_v44, %v125_v44 }
  0xcc   :  { %v127_v45 = vpop.f32.mrf.mxu1 }
  0xcd   :  { %v167_v6 = vmul.f32 %v127_v45, %v127_v45 }
  0xce   :  { %v131_v46 = vpop.f32.mrf.mxu1 }
  0xcf   :  { %v168_v5 = vmul.f32 %v131_v46, %v131_v46 }
  0xd0   :  { %v133_v47 = vpop.f32.mrf.mxu1 }
  0xd1   :  { %v169_v4 = vmul.f32 %v133_v47, %v133_v47 }
  0xd2   :  { %v137_v48 = vpop.f32.mrf.mxu1 }
  0xd3   :  { %v170_v3 = vmul.f32 %v137_v48, %v137_v48 }
  0xd4   :  { %v139_v49 = vpop.f32.mrf.mxu1 }
  0xd5   :  { %v171_v2 = vmul.f32 %v139_v49, %v139_v49 }
  0xd6   :  { %v143_v50 = vpop.f32.mrf.mxu1 }
  0xd7   :  { %v172_v1 = vmul.f32 %v143_v50, %v143_v50 }
  0xd8   :  { %v145_v51 = vpop.f32.mrf.mxu1 }
  0xd9   :  { %v173_v0 = vmul.f32 %v145_v51, %v145_v51 }
  0xda   :  { %v149_v52 = vpop.f32.mrf.mxu1 }
  0xdb   :  { %v174_v63 = vmul.f32 %v149_v52, %v149_v52 }
  0xdc   :  { %v151_v53 = vpop.f32.mrf.mxu1 }
  0xdd   :  { %v175_v62 = vmul.f32 %v151_v53, %v151_v53 }
  0xde   :  { %v155_v54 = vpop.f32.mrf.mxu1 }
  0xdf   :  { %v176_v61 = vmul.f32 %v155_v54, %v155_v54 }
  0xe0   :  { %v157_v55 = vpop.f32.mrf.mxu1 }
  0xe1   :  { %v177_v60 = vmul.f32 %v157_v55, %v157_v55 }
  0xe2   :  { %v161_v56 = vpop.f32.mrf.mxu1 }
  0xe3   :  { %v178_v59 = vmul.f32 %v161_v56, %v161_v56 }
  0xe4   :  { %v163_v57 = vpop.f32.mrf.mxu1 }
  0xe5   :  { %v179_v58 = vmul.f32 %v163_v57, %v163_v57 }
  0xe7   :  { %203 = vmatprep.subr.mxu1 %v179_v58 }
  0xe8   :  { %204 = vmatpush1.msra.mxu1 %v178_v59 }
  0xe9   :  { %205 = vmatprep.subr.mxu1 %v177_v60 }
  0xea   :  { %206 = vmatpush1.msra.mxu1 %v176_v61 }
  0xeb   :  { %207 = vmatprep.subr.mxu1 %v175_v62 }
  0xec   :  { %208 = vmatpush1.msra.mxu1 %v174_v63 }
  0xed   :  { %209 = vmatprep.subr.mxu1 %v173_v0 }
  0xee   :  { %210 = vmatpush1.msra.mxu1 %v172_v1 }
  0xef   :  { %211 = vmatprep.subr.mxu1 %v171_v2 }
  0xf0   :  { %212 = vmatpush1.msra.mxu1 %v170_v3 }
  0xf1   :  { %213 = vmatprep.subr.mxu1 %v169_v4 }
  0xf2   :  { %214 = vmatpush1.msra.mxu1 %v168_v5 }
  0xf3   :  { %215 = vmatprep.subr.mxu1 %v167_v6 }
  0xf4   :  { %216 = vmatpush1.msra.mxu1 %v166_v7 }
  0xf5   :  { %397 = vmatmul.mubr.msk.f32.vlgmr.msra.gmra.mxu1 %vm181_vm1, %v180_v8 }
 0x1b5   :  { %v251_v13 = vpop.f32.mrf.mxu1 }
 0x1b7   :  { %v253_v14 = vpop.f32.mrf.mxu1 }
 0x1b8   :  { %352 = vmatprep.mubr.f32.mxu0 %v253_v14 }
 0x1b9   :  { %353 = vmatmul.mubr.f32.vlgmr.msra.gmra.mxu0 %v251_v13 }
 0x279   :  { %v430_v15 = vpop.f32.mrf.mxu0 }
 0x27b   :  { %v431_v16 = vpop.f32.mrf.mxu0 }
 0x27c   :  { %v432_v17 = vadd.f32 %v431_v16, %v430_v15 }
 0x27e   :  { %v358_v19 = vsub.f32 0.0, %v432_v17 }
 0x280   :  { %v361_v20 = vmul.f32 %v360_v18, %v358_v19 }
 0x282   :  { %v363_v21 = vsel %vm362_vm2, %v361_v20, -inf }
 0x283   :  { %364 = vmax.xlane.f32.xlu0 %v363_v21 }
 0x30c   :  { %v365_v22 = vpop.xlane.xlu0 %364 }
 0x30d   :  { %v366_v23 = vsub.f32 %v361_v20, %v365_v22 }
 0x30f   :  { %v367_v24 = vmul.f32 1.442695, %v366_v23 }
 0x311   :  { %435 = vpow2.f32 %v367_v24 }
 0x31e   :  { %v436_v25 = vpop.eup %435 }
 0x31f   :  { %v369_v26 = vsel %vm362_vm2, %v436_v25, 0.0 }
 0x320   :  { %370 = vadd.xlane.f32.xlu0 %v369_v26 }
 0x3a9   :  { %v371_v27 = vpop.xlane.xlu0 %370 }
 0x3aa   :  { %437 = vlog2.f32 %v371_v27 }
 0x3b7   :  { %v438_v28 = vpop.eup %437 }
 0x3b8   :  { %v373_v29 = vmul.f32 0.6931472, %v438_v28 }
 0x3ba   :  { %v374_v30 = vsub.f32 %v366_v23, %v373_v29 }
 0x3bc   :  { %375 = vst.msk [vmem:[#allocation3] sm:$0x3] %vm362_vm2, %v374_v30 }
 0x3bd   :  { %450 = shalt.err (!%p447_p4)
}
 0x3be   :  { %385 = dma.vmem_to_hbm [thread:$0]  %s383_s9, 32, %s658_s5, [#allocation4]  }
 0x3bf   :  { %459 = dma.done.wait [#allocation4], 32  }
 0x3c0   :  { %460 = vsyncadd [#allocation4], 4294967264 }
 0x3c1   :  { %389 = vsyncpa [#allocation4], 1 }

</bundles_post_ra>
